<compile_context>
chip_gen: v6e
topology: v6e:2x2x1
jax: 0.10.0
libtpu: 0.0.40
codegen_flags: <defaults>
</compile_context>

<pallas_src>
import jax
import jax.numpy as jnp
from jax.experimental import pallas as pl
from jax.experimental.pallas import tpu as pltpu

LANE = 128


def _round_up(n, m):
    return ((n + m - 1) // m) * m


def _layer_dims(input_dim, hidden_dim):
    """Replicates LowRankAutoEncoder.__init__ dimension arithmetic.

    Returns the 9-entry chain of feature dims; layer i maps dims[i]->dims[i+1].
    """
    dim_diff = input_dim - hidden_dim
    step = dim_diff / 4
    mid3 = int(input_dim - step)
    mid2 = int(input_dim - 2 * step)
    mid1 = int(input_dim - 3 * step)
    return [input_dim, mid3, mid2, mid1, hidden_dim,
            mid1, mid2, mid3, input_dim]


def _ae_forward_kernel(x_ref, *refs):
    """x_ref: (in_pad, block_b) activations (features on sublanes, batch on lanes).

    refs = 8 weight refs (out_pad, in_pad), 8 bias refs (out_pad, 1),
           enc_ref (hid_pad, block_b), dec_ref (in_pad, block_b).
    """
    w = refs[0:8]
    b = refs[8:16]
    enc_ref, dec_ref = refs[16], refs[17]
    cdt = x_ref.dtype  # matmul compute dtype (bf16 on v6e/v7x, f32 on v5e)

    h = x_ref[...]

    # ---- encoder: Linear+ReLU x3, then Linear (no activation) ----
    for i in range(3):
        acc = jnp.dot(w[i][...], h, preferred_element_type=jnp.float32) + b[i][...]
        h = jnp.maximum(acc, 0.0).astype(cdt)
    enc = jnp.dot(w[3][...], h, preferred_element_type=jnp.float32) + b[3][...]
    enc_ref[...] = enc.astype(enc_ref.dtype)

    # ---- decoder: Linear+ReLU x3, then Linear (no activation) ----
    h = enc.astype(cdt)
    for i in range(4, 7):
        acc = jnp.dot(w[i][...], h, preferred_element_type=jnp.float32) + b[i][...]
        h = jnp.maximum(acc, 0.0).astype(cdt)
    dec = jnp.dot(w[7][...], h, preferred_element_type=jnp.float32) + b[7][...]
    dec_ref[...] = dec.astype(dec_ref.dtype)


def low_rank_autoencoder_forward(x, weights, biases, *, block_b=128,
                                 compute_dtype=jnp.bfloat16):
    """(encoded, decoded) = AE(x) with one Pallas kernel tiled over the batch.

    x:       (B, input_dim) float32
    weights: 8 arrays in native torch layout (out_dim, in_dim)
    biases:  8 arrays of shape (out_dim,)
    """
    B, D = x.shape
    hidden_dim = weights[3].shape[0]
    dims = _layer_dims(D, hidden_dim)
    pdims = [_round_up(d, LANE) for d in dims]
    assert B % block_b == 0, "batch must be a multiple of the batch tile"

    # Zero-pad every feature dim to a lane multiple, transpose the input to the
    # lane-dense (features, batch) orientation, and cast matmul operands once.
    x_p = jnp.zeros((pdims[0], B), compute_dtype).at[:D, :].set(
        x.T.astype(compute_dtype))
    w_p, b_p = [], []
    for i, (w, b) in enumerate(zip(weights, biases)):
        o, n = w.shape
        w_p.append(jnp.zeros((pdims[i + 1], pdims[i]), compute_dtype)
                   .at[:o, :n].set(w.astype(compute_dtype)))
        b_p.append(jnp.zeros((pdims[i + 1], 1), jnp.float32)
                   .at[:o, 0].set(b.astype(jnp.float32)))

    in_pad, hid_pad = pdims[0], pdims[4]

    in_specs = [pl.BlockSpec((in_pad, block_b), lambda i: (0, i))]
    # Weights / biases: full-extent blocks with constant index maps (no re-DMA
    # between grid steps).
    for wp in w_p:
        in_specs.append(pl.BlockSpec(wp.shape, lambda i: (0, 0)))
    for bp in b_p:
        in_specs.append(pl.BlockSpec(bp.shape, lambda i: (0, 0)))

    out_specs = (
        pl.BlockSpec((hid_pad, block_b), lambda i: (0, i)),
        pl.BlockSpec((in_pad, block_b), lambda i: (0, i)),
    )
    out_shape = (
        jax.ShapeDtypeStruct((hid_pad, B), jnp.float32),
        jax.ShapeDtypeStruct((in_pad, B), jnp.float32),
    )

    itemsize = jnp.dtype(compute_dtype).itemsize
    flops = 2 * B * sum(pdims[i] * pdims[i + 1] for i in range(8))
    bytes_accessed = (
        x_p.size * itemsize
        + sum(wp.size for wp in w_p) * itemsize
        + sum(bp.size for bp in b_p) * 4
        + (hid_pad + in_pad) * B * 4
    )

    enc_p, dec_p = pl.pallas_call(
        _ae_forward_kernel,
        grid=(B // block_b,),
        in_specs=in_specs,
        out_specs=out_specs,
        out_shape=out_shape,
        compiler_params=pltpu.CompilerParams(
            dimension_semantics=("parallel",)),
        cost_estimate=pl.CostEstimate(
            flops=flops, transcendentals=0, bytes_accessed=bytes_accessed),
    )(x_p, *w_p, *b_p)

    # Slice away the feature padding and transpose back to (batch, features).
    encoded = enc_p[:hidden_dim, :].T
    decoded = dec_p[:D, :].T
    return encoded, decoded


def init_params(key, input_dim, hidden_dim):
    """Kaiming-normal (fan_in, relu gain) weights + torch-default uniform biases.

    Weights are in the native torch nn.Linear layout (out_dim, in_dim).
    """
    dims = _layer_dims(input_dim, hidden_dim)
    weights, biases = [], []
    for i in range(8):
        fan_in, fan_out = dims[i], dims[i + 1]
        key, kw, kb = jax.random.split(key, 3)
        std = jnp.sqrt(2.0 / fan_in)  # kaiming_normal_, nonlinearity='relu'
        w = jax.random.normal(kw, (fan_out, fan_in), jnp.float32) * std
        bound = 1.0 / jnp.sqrt(float(fan_in))
        b = jax.random.uniform(kb, (fan_out,), jnp.float32, -bound, bound)
        weights.append(w)
        biases.append(b)
    return key, weights, biases


def _reference_forward(x, weights, biases, compute_dtype=jnp.bfloat16):
    """Pure-JAX reference with the same dtype policy (bf16 operands, f32 accum)."""
    ws = [w.astype(compute_dtype) for w in weights]
    bs = [b.astype(jnp.float32) for b in biases]

    def linear(h, w, b):
        return jnp.dot(h, w.T, preferred_element_type=jnp.float32) + b

    h = x.astype(compute_dtype)
    for i in range(3):
        h = jnp.maximum(linear(h, ws[i], bs[i]), 0.0).astype(compute_dtype)
    enc = linear(h, ws[3], bs[3])
    h = enc.astype(compute_dtype)
    for i in range(4, 7):
        h = jnp.maximum(linear(h, ws[i], bs[i]), 0.0).astype(compute_dtype)
    dec = linear(h, ws[7], bs[7])
    return enc, dec


if __name__ == "__main__":
    input_dim, hidden_dim = 32, 8   # network: 32 -> 26 -> 20 -> 14 -> 8 -> ... -> 32
    batch = 512                      # 4 parallel grid steps of 128-lane batch tiles

    key = jax.random.PRNGKey(0)
    key, weights, biases = init_params(key, input_dim, hidden_dim)
    key, kx = jax.random.split(key)
    x = jax.random.normal(kx, (batch, input_dim), jnp.float32)

    encoded, decoded = low_rank_autoencoder_forward(
        x, weights, biases, block_b=128, compute_dtype=jnp.bfloat16)
    jax.block_until_ready((encoded, decoded))

    enc_ref, dec_ref = _reference_forward(x, weights, biases, jnp.bfloat16)
    assert encoded.shape == (batch, hidden_dim)
    assert decoded.shape == (batch, input_dim)
    assert jnp.allclose(encoded, enc_ref, atol=1e-2, rtol=1e-2), \
        float(jnp.max(jnp.abs(encoded - enc_ref)))
    assert jnp.allclose(decoded, dec_ref, atol=1e-2, rtol=1e-2), \
        float(jnp.max(jnp.abs(decoded - dec_ref)))

    print("KERNEL_OK")
</pallas_src>

<mosaic_0001>
module attributes {stable_mosaic.version = 11 : i64} {
  func.func @_ae_forward_kernel(%arg0: i32, %arg1: memref<128x128xbf16, #tpu.memory_space<vmem>>, %arg2: memref<128x128xbf16, #tpu.memory_space<vmem>>, %arg3: memref<128x128xbf16, #tpu.memory_space<vmem>>, %arg4: memref<128x128xbf16, #tpu.memory_space<vmem>>, %arg5: memref<128x128xbf16, #tpu.memory_space<vmem>>, %arg6: memref<128x128xbf16, #tpu.memory_space<vmem>>, %arg7: memref<128x128xbf16, #tpu.memory_space<vmem>>, %arg8: memref<128x128xbf16, #tpu.memory_space<vmem>>, %arg9: memref<128x128xbf16, #tpu.memory_space<vmem>>, %arg10: memref<128x1xf32, #tpu.memory_space<vmem>>, %arg11: memref<128x1xf32, #tpu.memory_space<vmem>>, %arg12: memref<128x1xf32, #tpu.memory_space<vmem>>, %arg13: memref<128x1xf32, #tpu.memory_space<vmem>>, %arg14: memref<128x1xf32, #tpu.memory_space<vmem>>, %arg15: memref<128x1xf32, #tpu.memory_space<vmem>>, %arg16: memref<128x1xf32, #tpu.memory_space<vmem>>, %arg17: memref<128x1xf32, #tpu.memory_space<vmem>>, %arg18: memref<128x128xf32, #tpu.memory_space<vmem>>, %arg19: memref<128x128xf32, #tpu.memory_space<vmem>>) attributes {dimension_semantics = [#tpu.dimension_semantics<parallel>], iteration_bounds = array<i64: 4>, scalar_prefetch = 0 : i64, scratch_operands = 0 : i64, tpu.core_type = #tpu.core_type<tc>, window_params = [{transform_indices = @transform_0, window_bounds = array<i64: 128, 128>}, {pipeline_mode = #tpu.pipeline_mode<synchronous>, transform_indices = @transform_1, window_bounds = array<i64: 128, 128>}, {pipeline_mode = #tpu.pipeline_mode<synchronous>, transform_indices = @transform_2, window_bounds = array<i64: 128, 128>}, {pipeline_mode = #tpu.pipeline_mode<synchronous>, transform_indices = @transform_3, window_bounds = array<i64: 128, 128>}, {pipeline_mode = #tpu.pipeline_mode<synchronous>, transform_indices = @transform_4, window_bounds = array<i64: 128, 128>}, {pipeline_mode = #tpu.pipeline_mode<synchronous>, transform_indices = @transform_5, window_bounds = array<i64: 128, 128>}, {pipeline_mode = #tpu.pipeline_mode<synchronous>, transform_indices = @transform_6, window_bounds = array<i64: 128, 128>}, {pipeline_mode = #tpu.pipeline_mode<synchronous>, transform_indices = @transform_7, window_bounds = array<i64: 128, 128>}, {pipeline_mode = #tpu.pipeline_mode<synchronous>, transform_indices = @transform_8, window_bounds = array<i64: 128, 128>}, {pipeline_mode = #tpu.pipeline_mode<synchronous>, transform_indices = @transform_9, window_bounds = array<i64: 128, 1>}, {pipeline_mode = #tpu.pipeline_mode<synchronous>, transform_indices = @transform_10, window_bounds = array<i64: 128, 1>}, {pipeline_mode = #tpu.pipeline_mode<synchronous>, transform_indices = @transform_11, window_bounds = array<i64: 128, 1>}, {pipeline_mode = #tpu.pipeline_mode<synchronous>, transform_indices = @transform_12, window_bounds = array<i64: 128, 1>}, {pipeline_mode = #tpu.pipeline_mode<synchronous>, transform_indices = @transform_13, window_bounds = array<i64: 128, 1>}, {pipeline_mode = #tpu.pipeline_mode<synchronous>, transform_indices = @transform_14, window_bounds = array<i64: 128, 1>}, {pipeline_mode = #tpu.pipeline_mode<synchronous>, transform_indices = @transform_15, window_bounds = array<i64: 128, 1>}, {pipeline_mode = #tpu.pipeline_mode<synchronous>, transform_indices = @transform_16, window_bounds = array<i64: 128, 1>}, {transform_indices = @transform_17, window_bounds = array<i64: 128, 128>}, {transform_indices = @transform_18, window_bounds = array<i64: 128, 128>}]} {
    %c0 = arith.constant 0 : index
    %c0_0 = arith.constant 0 : index
    %0 = vector.load %arg1[%c0, %c0_0] : memref<128x128xbf16, #tpu.memory_space<vmem>>, vector<128x128xbf16>
    %c0_1 = arith.constant 0 : index
    %c0_2 = arith.constant 0 : index
    %1 = vector.load %arg2[%c0_1, %c0_2] : memref<128x128xbf16, #tpu.memory_space<vmem>>, vector<128x128xbf16>
    %cst = arith.constant dense<0.000000e+00> : vector<128x128xf32>
    %2 = tpu.matmul %1, %0, %cst {dimension_numbers = #tpu.dot_dimension_numbers<[1], [0], [0], [1], [0, 0, 1, 1], [], []>} : vector<128x128xbf16>, vector<128x128xbf16>, vector<128x128xf32> -> vector<128x128xf32>
    %c0_3 = arith.constant 0 : index
    %c0_4 = arith.constant 0 : index
    %3 = vector.load %arg10[%c0_3, %c0_4] : memref<128x1xf32, #tpu.memory_space<vmem>>, vector<128x1xf32>
    %4 = vector.broadcast %3 : vector<128x1xf32> to vector<128x128xf32>
    %5 = arith.addf %2, %4 : vector<128x128xf32>
    %cst_5 = arith.constant 0.000000e+00 : f32
    %6 = vector.broadcast %cst_5 : f32 to vector<128x128xf32>
    %7 = arith.maximumf %5, %6 : vector<128x128xf32>
    %8 = arith.truncf %7 : vector<128x128xf32> to vector<128x128xbf16>
    %c0_6 = arith.constant 0 : index
    %c0_7 = arith.constant 0 : index
    %9 = vector.load %arg3[%c0_6, %c0_7] : memref<128x128xbf16, #tpu.memory_space<vmem>>, vector<128x128xbf16>
    %cst_8 = arith.constant dense<0.000000e+00> : vector<128x128xf32>
    %10 = tpu.matmul %9, %8, %cst_8 {dimension_numbers = #tpu.dot_dimension_numbers<[1], [0], [0], [1], [0, 0, 1, 1], [], []>} : vector<128x128xbf16>, vector<128x128xbf16>, vector<128x128xf32> -> vector<128x128xf32>
    %c0_9 = arith.constant 0 : index
    %c0_10 = arith.constant 0 : index
    %11 = vector.load %arg11[%c0_9, %c0_10] : memref<128x1xf32, #tpu.memory_space<vmem>>, vector<128x1xf32>
    %12 = vector.broadcast %11 : vector<128x1xf32> to vector<128x128xf32>
    %13 = arith.addf %10, %12 : vector<128x128xf32>
    %cst_11 = arith.constant 0.000000e+00 : f32
    %14 = vector.broadcast %cst_11 : f32 to vector<128x128xf32>
    %15 = arith.maximumf %13, %14 : vector<128x128xf32>
    %16 = arith.truncf %15 : vector<128x128xf32> to vector<128x128xbf16>
    %c0_12 = arith.constant 0 : index
    %c0_13 = arith.constant 0 : index
    %17 = vector.load %arg4[%c0_12, %c0_13] : memref<128x128xbf16, #tpu.memory_space<vmem>>, vector<128x128xbf16>
    %cst_14 = arith.constant dense<0.000000e+00> : vector<128x128xf32>
    %18 = tpu.matmul %17, %16, %cst_14 {dimension_numbers = #tpu.dot_dimension_numbers<[1], [0], [0], [1], [0, 0, 1, 1], [], []>} : vector<128x128xbf16>, vector<128x128xbf16>, vector<128x128xf32> -> vector<128x128xf32>
    %c0_15 = arith.constant 0 : index
    %c0_16 = arith.constant 0 : index
    %19 = vector.load %arg12[%c0_15, %c0_16] : memref<128x1xf32, #tpu.memory_space<vmem>>, vector<128x1xf32>
    %20 = vector.broadcast %19 : vector<128x1xf32> to vector<128x128xf32>
    %21 = arith.addf %18, %20 : vector<128x128xf32>
    %cst_17 = arith.constant 0.000000e+00 : f32
    %22 = vector.broadcast %cst_17 : f32 to vector<128x128xf32>
    %23 = arith.maximumf %21, %22 : vector<128x128xf32>
    %24 = arith.truncf %23 : vector<128x128xf32> to vector<128x128xbf16>
    %c0_18 = arith.constant 0 : index
    %c0_19 = arith.constant 0 : index
    %25 = vector.load %arg5[%c0_18, %c0_19] : memref<128x128xbf16, #tpu.memory_space<vmem>>, vector<128x128xbf16>
    %cst_20 = arith.constant dense<0.000000e+00> : vector<128x128xf32>
    %26 = tpu.matmul %25, %24, %cst_20 {dimension_numbers = #tpu.dot_dimension_numbers<[1], [0], [0], [1], [0, 0, 1, 1], [], []>} : vector<128x128xbf16>, vector<128x128xbf16>, vector<128x128xf32> -> vector<128x128xf32>
    %c0_21 = arith.constant 0 : index
    %c0_22 = arith.constant 0 : index
    %27 = vector.load %arg13[%c0_21, %c0_22] : memref<128x1xf32, #tpu.memory_space<vmem>>, vector<128x1xf32>
    %28 = vector.broadcast %27 : vector<128x1xf32> to vector<128x128xf32>
    %29 = arith.addf %26, %28 : vector<128x128xf32>
    %c0_23 = arith.constant 0 : index
    %c0_24 = arith.constant 0 : index
    %30 = vector.load %arg18[%c0_23, %c0_24] : memref<128x128xf32, #tpu.memory_space<vmem>>, vector<128x128xf32>
    tpu.vector_store %arg18[%c0_23, %c0_24], %29 {strides = array<i32>} : memref<128x128xf32, #tpu.memory_space<vmem>>, vector<128x128xf32>,
    %31 = arith.truncf %29 : vector<128x128xf32> to vector<128x128xbf16>
    %c0_25 = arith.constant 0 : index
    %c0_26 = arith.constant 0 : index
    %32 = vector.load %arg6[%c0_25, %c0_26] : memref<128x128xbf16, #tpu.memory_space<vmem>>, vector<128x128xbf16>
    %cst_27 = arith.constant dense<0.000000e+00> : vector<128x128xf32>
    %33 = tpu.matmul %32, %31, %cst_27 {dimension_numbers = #tpu.dot_dimension_numbers<[1], [0], [0], [1], [0, 0, 1, 1], [], []>} : vector<128x128xbf16>, vector<128x128xbf16>, vector<128x128xf32> -> vector<128x128xf32>
    %c0_28 = arith.constant 0 : index
    %c0_29 = arith.constant 0 : index
    %34 = vector.load %arg14[%c0_28, %c0_29] : memref<128x1xf32, #tpu.memory_space<vmem>>, vector<128x1xf32>
    %35 = vector.broadcast %34 : vector<128x1xf32> to vector<128x128xf32>
    %36 = arith.addf %33, %35 : vector<128x128xf32>
    %cst_30 = arith.constant 0.000000e+00 : f32
    %37 = vector.broadcast %cst_30 : f32 to vector<128x128xf32>
    %38 = arith.maximumf %36, %37 : vector<128x128xf32>
    %39 = arith.truncf %38 : vector<128x128xf32> to vector<128x128xbf16>
    %c0_31 = arith.constant 0 : index
    %c0_32 = arith.constant 0 : index
    %40 = vector.load %arg7[%c0_31, %c0_32] : memref<128x128xbf16, #tpu.memory_space<vmem>>, vector<128x128xbf16>
    %cst_33 = arith.constant dense<0.000000e+00> : vector<128x128xf32>
    %41 = tpu.matmul %40, %39, %cst_33 {dimension_numbers = #tpu.dot_dimension_numbers<[1], [0], [0], [1], [0, 0, 1, 1], [], []>} : vector<128x128xbf16>, vector<128x128xbf16>, vector<128x128xf32> -> vector<128x128xf32>
    %c0_34 = arith.constant 0 : index
    %c0_35 = arith.constant 0 : index
    %42 = vector.load %arg15[%c0_34, %c0_35] : memref<128x1xf32, #tpu.memory_space<vmem>>, vector<128x1xf32>
    %43 = vector.broadcast %42 : vector<128x1xf32> to vector<128x128xf32>
    %44 = arith.addf %41, %43 : vector<128x128xf32>
    %cst_36 = arith.constant 0.000000e+00 : f32
    %45 = vector.broadcast %cst_36 : f32 to vector<128x128xf32>
    %46 = arith.maximumf %44, %45 : vector<128x128xf32>
    %47 = arith.truncf %46 : vector<128x128xf32> to vector<128x128xbf16>
    %c0_37 = arith.constant 0 : index
    %c0_38 = arith.constant 0 : index
    %48 = vector.load %arg8[%c0_37, %c0_38] : memref<128x128xbf16, #tpu.memory_space<vmem>>, vector<128x128xbf16>
    %cst_39 = arith.constant dense<0.000000e+00> : vector<128x128xf32>
    %49 = tpu.matmul %48, %47, %cst_39 {dimension_numbers = #tpu.dot_dimension_numbers<[1], [0], [0], [1], [0, 0, 1, 1], [], []>} : vector<128x128xbf16>, vector<128x128xbf16>, vector<128x128xf32> -> vector<128x128xf32>
    %c0_40 = arith.constant 0 : index
    %c0_41 = arith.constant 0 : index
    %50 = vector.load %arg16[%c0_40, %c0_41] : memref<128x1xf32, #tpu.memory_space<vmem>>, vector<128x1xf32>
    %51 = vector.broadcast %50 : vector<128x1xf32> to vector<128x128xf32>
    %52 = arith.addf %49, %51 : vector<128x128xf32>
    %cst_42 = arith.constant 0.000000e+00 : f32
    %53 = vector.broadcast %cst_42 : f32 to vector<128x128xf32>
    %54 = arith.maximumf %52, %53 : vector<128x128xf32>
    %55 = arith.truncf %54 : vector<128x128xf32> to vector<128x128xbf16>
    %c0_43 = arith.constant 0 : index
    %c0_44 = arith.constant 0 : index
    %56 = vector.load %arg9[%c0_43, %c0_44] : memref<128x128xbf16, #tpu.memory_space<vmem>>, vector<128x128xbf16>
    %cst_45 = arith.constant dense<0.000000e+00> : vector<128x128xf32>
    %57 = tpu.matmul %56, %55, %cst_45 {dimension_numbers = #tpu.dot_dimension_numbers<[1], [0], [0], [1], [0, 0, 1, 1], [], []>} : vector<128x128xbf16>, vector<128x128xbf16>, vector<128x128xf32> -> vector<128x128xf32>
    %c0_46 = arith.constant 0 : index
    %c0_47 = arith.constant 0 : index
    %58 = vector.load %arg17[%c0_46, %c0_47] : memref<128x1xf32, #tpu.memory_space<vmem>>, vector<128x1xf32>
    %59 = vector.broadcast %58 : vector<128x1xf32> to vector<128x128xf32>
    %60 = arith.addf %57, %59 : vector<128x128xf32>
    %c0_48 = arith.constant 0 : index
    %c0_49 = arith.constant 0 : index
    %61 = vector.load %arg19[%c0_48, %c0_49] : memref<128x128xf32, #tpu.memory_space<vmem>>, vector<128x128xf32>
    tpu.vector_store %arg19[%c0_48, %c0_49], %60 {strides = array<i32>} : memref<128x128xf32, #tpu.memory_space<vmem>>, vector<128x128xf32>,
    return
  }
  func.func @transform_0(%arg0: i32) -> (i32, i32) {
    %c0_i32 = arith.constant 0 : i32
    %c0_i32_0 = arith.constant 0 : i32
    return %c0_i32, %arg0 : i32, i32
  }
  func.func @transform_1(%arg0: i32) -> (i32, i32) {
    %c0_i32 = arith.constant 0 : i32
    %c0_i32_0 = arith.constant 0 : i32
    %c0_i32_1 = arith.constant 0 : i32
    return %c0_i32, %c0_i32_0 : i32, i32
  }
  func.func @transform_2(%arg0: i32) -> (i32, i32) {
    %c0_i32 = arith.constant 0 : i32
    %c0_i32_0 = arith.constant 0 : i32
    %c0_i32_1 = arith.constant 0 : i32
    return %c0_i32, %c0_i32_0 : i32, i32
  }
  func.func @transform_3(%arg0: i32) -> (i32, i32) {
    %c0_i32 = arith.constant 0 : i32
    %c0_i32_0 = arith.constant 0 : i32
    %c0_i32_1 = arith.constant 0 : i32
    return %c0_i32, %c0_i32_0 : i32, i32
  }
  func.func @transform_4(%arg0: i32) -> (i32, i32) {
    %c0_i32 = arith.constant 0 : i32
    %c0_i32_0 = arith.constant 0 : i32
    %c0_i32_1 = arith.constant 0 : i32
    return %c0_i32, %c0_i32_0 : i32, i32
  }
  func.func @transform_5(%arg0: i32) -> (i32, i32) {
    %c0_i32 = arith.constant 0 : i32
    %c0_i32_0 = arith.constant 0 : i32
    %c0_i32_1 = arith.constant 0 : i32
    return %c0_i32, %c0_i32_0 : i32, i32
  }
  func.func @transform_6(%arg0: i32) -> (i32, i32) {
    %c0_i32 = arith.constant 0 : i32
    %c0_i32_0 = arith.constant 0 : i32
    %c0_i32_1 = arith.constant 0 : i32
    return %c0_i32, %c0_i32_0 : i32, i32
  }
  func.func @transform_7(%arg0: i32) -> (i32, i32) {
    %c0_i32 = arith.constant 0 : i32
    %c0_i32_0 = arith.constant 0 : i32
    %c0_i32_1 = arith.constant 0 : i32
    return %c0_i32, %c0_i32_0 : i32, i32
  }
  func.func @transform_8(%arg0: i32) -> (i32, i32) {
    %c0_i32 = arith.constant 0 : i32
    %c0_i32_0 = arith.constant 0 : i32
    %c0_i32_1 = arith.constant 0 : i32
    return %c0_i32, %c0_i32_0 : i32, i32
  }
  func.func @transform_9(%arg0: i32) -> (i32, i32) {
    %c0_i32 = arith.constant 0 : i32
    %c0_i32_0 = arith.constant 0 : i32
    %c0_i32_1 = arith.constant 0 : i32
    return %c0_i32, %c0_i32_0 : i32, i32
  }
  func.func @transform_10(%arg0: i32) -> (i32, i32) {
    %c0_i32 = arith.constant 0 : i32
    %c0_i32_0 = arith.constant 0 : i32
    %c0_i32_1 = arith.constant 0 : i32
    return %c0_i32, %c0_i32_0 : i32, i32
  }
  func.func @transform_11(%arg0: i32) -> (i32, i32) {
    %c0_i32 = arith.constant 0 : i32
    %c0_i32_0 = arith.constant 0 : i32
    %c0_i32_1 = arith.constant 0 : i32
    return %c0_i32, %c0_i32_0 : i32, i32
  }
  func.func @transform_12(%arg0: i32) -> (i32, i32) {
    %c0_i32 = arith.constant 0 : i32
    %c0_i32_0 = arith.constant 0 : i32
    %c0_i32_1 = arith.constant 0 : i32
    return %c0_i32, %c0_i32_0 : i32, i32
  }
  func.func @transform_13(%arg0: i32) -> (i32, i32) {
    %c0_i32 = arith.constant 0 : i32
    %c0_i32_0 = arith.constant 0 : i32
    %c0_i32_1 = arith.constant 0 : i32
    return %c0_i32, %c0_i32_0 : i32, i32
  }
  func.func @transform_14(%arg0: i32) -> (i32, i32) {
    %c0_i32 = arith.constant 0 : i32
    %c0_i32_0 = arith.constant 0 : i32
    %c0_i32_1 = arith.constant 0 : i32
    return %c0_i32, %c0_i32_0 : i32, i32
  }
  func.func @transform_15(%arg0: i32) -> (i32, i32) {
    %c0_i32 = arith.constant 0 : i32
    %c0_i32_0 = arith.constant 0 : i32
    %c0_i32_1 = arith.constant 0 : i32
    return %c0_i32, %c0_i32_0 : i32, i32
  }
  func.func @transform_16(%arg0: i32) -> (i32, i32) {
    %c0_i32 = arith.constant 0 : i32
    %c0_i32_0 = arith.constant 0 : i32
    %c0_i32_1 = arith.constant 0 : i32
    return %c0_i32, %c0_i32_0 : i32, i32
  }
  func.func @transform_17(%arg0: i32) -> (i32, i32) {
    %c0_i32 = arith.constant 0 : i32
    %c0_i32_0 = arith.constant 0 : i32
    return %c0_i32, %arg0 : i32, i32
  }
  func.func @transform_18(%arg0: i32) -> (i32, i32) {
    %c0_i32 = arith.constant 0 : i32
    %c0_i32_0 = arith.constant 0 : i32
    return %c0_i32, %arg0 : i32, i32
  }
}

</mosaic_0001>

<bundles_post_ra>
// kernel: tpu_custom_call.1
= control target key start
LH: loop header
LB: loop body
LE: loop exit
PB: predicated region body
PF: predicated region fallthrough
CT: control target
= control target key end

     0   :  { %s4850_s0 = inlined_call_operand.vmem [shape: bf16[128,512], index: 0, kind: input, shape index: {}]   ;;  %s4851_s1 = inlined_call_operand.vmem [shape: bf16[128,128], index: 1, kind: input, shape index: {}]   ;;  %s4852_s2 = inlined_call_operand.vmem [shape: bf16[128,128], index: 2, kind: input, shape index: {}]   ;;  %s4853_s3 = inlined_call_operand.vmem [shape: bf16[128,128], index: 3, kind: input, shape index: {}]   ;;  %s4854_s4 = inlined_call_operand.vmem [shape: bf16[128,128], index: 4, kind: input, shape index: {}]   ;;  %s4855_s5 = inlined_call_operand.vmem [shape: bf16[128,128], index: 5, kind: input, shape index: {}]   ;;  %s4856_s6 = inlined_call_operand.vmem [shape: bf16[128,128], index: 6, kind: input, shape index: {}]   ;;  %s4857_s7 = inlined_call_operand.vmem [shape: bf16[128,128], index: 7, kind: input, shape index: {}]   ;;  %s4858_s8 = inlined_call_operand.vmem [shape: bf16[128,128], index: 8, kind: input, shape index: {}]   ;;  %s4859_s9 = inlined_call_operand.vmem [shape: f32[128,1], index: 9, kind: input, shape index: {}]   ;;  %s4860_s10 = inlined_call_operand.vmem [shape: f32[128,1], index: 10, kind: input, shape index: {}]   ;;  %s4861_s11 = inlined_call_operand.vmem [shape: f32[128,1], index: 11, kind: input, shape index: {}]   ;;  %s4862_s12 = inlined_call_operand.vmem [shape: f32[128,1], index: 12, kind: input, shape index: {}]   ;;  %s4863_s13 = inlined_call_operand.vmem [shape: f32[128,1], index: 13, kind: input, shape index: {}]   ;;  %s4864_s14 = inlined_call_operand.vmem [shape: f32[128,1], index: 14, kind: input, shape index: {}]   ;;  %s4865_s15 = inlined_call_operand.vmem [shape: f32[128,1], index: 15, kind: input, shape index: {}]   ;;  %s4866_s16 = inlined_call_operand.vmem [shape: f32[128,1], index: 16, kind: input, shape index: {}]   ;;  %s4867_s17 = inlined_call_operand.hbm [shape: f32[128,512], index: 17, kind: output, shape index: {0}]   ;;  %s4868_s18 = inlined_call_operand.hbm [shape: f32[128,512], index: 18, kind: output, shape index: {1}]  }
   0x1   :  { %4879 = sst [smem:[#allocation13_spill]] %s4850_s0 }
   0x2   :  { %4880 = sst [smem:[#allocation14_spill]] %s4851_s1 }
   0x3   :  { %4881 = sst [smem:[#allocation15_spill]] %s4852_s2 }
   0x4   :  { %4882 = sst [smem:[#allocation16_spill]] %s4853_s3 }
   0x5   :  { %4883 = sst [smem:[#allocation17_spill]] %s4854_s4 }
   0x6   :  { %4884 = sst [smem:[#allocation18_spill]] %s4859_s9 }
   0x7   :  { %4885 = sst [smem:[#allocation19_spill]] %s4860_s10 }
   0x8   :  { %24 = vsyncpa [#allocation4], 0 }
   0x9   :  { %26 = vsyncpa [#allocation4 + $0x1], 0 }
   0xa   :  { %27 = vsyncpa [#allocation6], 0 }
   0xb   :  { %29 = vsyncpa [#allocation6 + $0x1], 0  ;;  %s3912_s27 = smov 0   ;;  %s3914_s28 = smov 0  }
   0xc   :  { %s3916_s29 = smov 0   ;;  %s3918_s30 = smov 0  }
   0xd LB: > { %4886 = sst [smem:[#allocation9_spill]] %s3801_s28  ;;  %s4871_s0 = sadd.s32 4294967295, %s3809_s30   ;;  %s3809_s30 = sphi %s3918_s30, %s4904_s30   ;;  %s3805_s29 = sphi %s3916_s29, %s4907_s29   ;;  %s3801_s28 = sphi %s3914_s28, %s4906_s28   ;;  %s3797_s27 = sphi %s3912_s27, %s4905_s27  }
   0xe   : > { %4887 = sst [smem:[#allocation10_spill]] %s3805_s29  ;;  %s3126_s19 = sadd.s32 4294967294, %s3809_s30  }
   0xf   : > { %s3935_s1 = sadd.s32 1, %s3809_s30   ;;  %s42_s20 = sadd.s32 1, %s3805_s29 }
  0x10   : > { %4888 = sst [smem:[#allocation11_spill]] %s3935_s1  ;;  %s39_s21 = ssub.s32 %s3809_s30, %s3935_s1 }
  0x11   : > { %p49_p0 = scmp.ne.s32.totalorder %s3805_s29, %s3801_s28  ;;  %p40_p1 = scmp.eq.s32.totalorder %s39_s21, 0 }
  0x12   : > { %p50_p2 = scmp.eq.s32.totalorder %s3809_s30, 0  ;;  %p415_p3 = scmp.eq.s32.totalorder %s4871_s0, 3 }
  0x13   : > { %p420_p4 = scmp.ne.s32.totalorder %s3801_s28, %s3797_s27  ;;  %p421_p7 = scmp.eq.s32.totalorder %s3126_s19, 3 }
  0x14   : > { %s3948_s22 = scalar_select %p40_p1, %s3805_s29, %s42_s20  }
  0x15   : > { %p51_p5 = por %p50_p2, %p49_p0  ;;  %p3950_p6 = por %p415_p3, %p49_p0 }
  0x16   : > { %4889 = sst [smem:[#allocation12_spill]] %s3948_s22  ;;  %p3954_p8 = por %p421_p7, %p420_p4 }
  0x17   : > { %p3128_p9 = scmp.ge.s32.totalorder %s3809_s30, 4 }
  0x19   : > { %511 = sbr.rel (%p3128_p9) target bundleno = 51 (0x33), region = 80 }
  0x1e   : > { %514 = sbr.rel (!%p51_p5) target bundleno = 51 (0x33), region = 84  ;;  %s516_s24 = sand.u32 (%p51_p5), 1, %s3805_s29  }
  0x1f   : > { %s3130_s25 = sshll.u32 (%p51_p5), %s3809_s30, 2  ;;  %s3129_s26 = sshll.u32 (%p51_p5), %s516_s24, 6 }
  0x20   : > { %s4892_s0 = sld [smem:[#allocation13_spill]] (%p51_p5)  ;;  %s518_s19 = scalar_lea.vmem (%p51_p5), [#allocation2], %s3129_s26 }
  0x26   : > { %s3964_s22 = scalar_lea.vmem %s4892_s0, %s3130_s25 }
  0x27   : > { %v537_v0 = vld [vmem:[%s3964_s22] sm:$0xf]  ;;  %v539_v1 = vld [vmem:[%s3964_s22 + $0x10] sm:$0xf] }
  0x28   : > { %538 = vst [vmem:[%s518_s19] sm:$0xf] %v537_v0  ;;  %540 = vst [vmem:[%s518_s19 + $0x4] sm:$0xf] %v539_v1  ;;  %v541_v2 = vld [vmem:[%s3964_s22 + $0x20] sm:$0xf] }
  0x29   : > { %v543_v3 = vld [vmem:[%s3964_s22 + $0x30] sm:$0xf]  ;;  %v545_v4 = vld [vmem:[%s3964_s22 + $0x40] sm:$0xf]  ;;  %542 = vst [vmem:[%s518_s19 + $0x8] sm:$0xf] %v541_v2 }
  0x2a   : > { %544 = vst [vmem:[%s518_s19 + $0xc] sm:$0xf] %v543_v3  ;;  %546 = vst [vmem:[%s518_s19 + $0x10] sm:$0xf] %v545_v4  ;;  %v547_v5 = vld [vmem:[%s3964_s22 + $0x50] sm:$0xf] }
  0x2b   : > { %v549_v6 = vld [vmem:[%s3964_s22 + $0x60] sm:$0xf]  ;;  %v551_v7 = vld [vmem:[%s3964_s22 + $0x70] sm:$0xf]  ;;  %548 = vst [vmem:[%s518_s19 + $0x14] sm:$0xf] %v547_v5 }
  0x2c   : > { %550 = vst [vmem:[%s518_s19 + $0x18] sm:$0xf] %v549_v6  ;;  %552 = vst [vmem:[%s518_s19 + $0x1c] sm:$0xf] %v551_v7  ;;  %v553_v8 = vld [vmem:[%s3964_s22 + $0x80] sm:$0xf] }
  0x2d   : > { %v555_v9 = vld [vmem:[%s3964_s22 + $0x90] sm:$0xf]  ;;  %v557_v10 = vld [vmem:[%s3964_s22 + $0xa0] sm:$0xf]  ;;  %554 = vst [vmem:[%s518_s19 + $0x20] sm:$0xf] %v553_v8 }
  0x2e   : > { %556 = vst [vmem:[%s518_s19 + $0x24] sm:$0xf] %v555_v9  ;;  %558 = vst [vmem:[%s518_s19 + $0x28] sm:$0xf] %v557_v10  ;;  %v559_v11 = vld [vmem:[%s3964_s22 + $0xb0] sm:$0xf] }
  0x2f   : > { %v561_v12 = vld [vmem:[%s3964_s22 + $0xc0] sm:$0xf]  ;;  %v563_v13 = vld [vmem:[%s3964_s22 + $0xd0] sm:$0xf]  ;;  %560 = vst [vmem:[%s518_s19 + $0x2c] sm:$0xf] %v559_v11 }
  0x30   : > { %562 = vst [vmem:[%s518_s19 + $0x30] sm:$0xf] %v561_v12  ;;  %564 = vst [vmem:[%s518_s19 + $0x34] sm:$0xf] %v563_v13  ;;  %v565_v14 = vld [vmem:[%s3964_s22 + $0xe0] sm:$0xf] }
  0x31   : > { %v567_v15 = vld [vmem:[%s3964_s22 + $0xf0] sm:$0xf]  ;;  %566 = vst [vmem:[%s518_s19 + $0x38] sm:$0xf] %v565_v14 }
  0x32   : > { %568 = vst [vmem:[%s518_s19 + $0x3c] sm:$0xf] %v567_v15 }
  0x33 PF: > { %p3131_p10 = scmp.ge.s32.totalorder %s3809_s30, 1  ;;  %p623_p11 = scmp.lt.s32.totalorder %s3809_s30, 5 }
  0x35   : > { %p624_p12 = pnand %p3131_p10, %p623_p11 }
  0x36   : > { %s4893_s9 = sld [smem:[#allocation18_spill]] (!%p624_p12)  ;;  %s3991_s22 = sand.u32 (!%p624_p12), 1, %s3801_s28  }
  0x37   : > { %627 = sbr.rel (%p624_p12) target bundleno = 2145 (0x861), region = 125  ;;  %s3132_s20 = sshll.u32 (!%p624_p12), %s3991_s22, 6 }
  0x38   : > { %s4000_s29 = scalar_lea.vmem (!%p624_p12), [#allocation2], %s3132_s20  ;;  %s4894_s21 = sld [smem:[#allocation14_spill]] (!%p624_p12) }
  0x39   : > { %s4895_s10 = sld [smem:[#allocation19_spill]] (!%p624_p12)  ;;  %s4876_s25 = sshll.u32 (!%p624_p12), %s3991_s22, 7 }
  0x3a   : > { %s4897_s3 = sld [smem:[#allocation16_spill]] (!%p624_p12)  ;;  %s4597_s26 = scalar_lea.vmem (!%p624_p12), [#allocation3], %s4876_s25 }
  0x3b   : > { %s4898_s4 = sld [smem:[#allocation17_spill]] (!%p624_p12)  ;;  %s4899_s20 = sadd.s32 (!%p624_p12), 4294967295, %s3809_s30  }
  0x3c   : > { %v735_v16 = vld [vmem:[%s4893_s9 + $0x70] sm:$0xff]  ;;  %v733_v17 = vld [vmem:[%s4893_s9 + $0x60] sm:$0xff]  ;;  %v3811_v18 = vmov 0   ;;  %v736_v19 = vld [vmem:[%s4893_s9 + $0x78] sm:$0xff]  ;;  %s4743_s0 = sshll.u32 %s4899_s20, 7  ;;  %s3011_s28 = sshll.u32 %s4597_s26, 4  ;;  %s4752_s28 = int_to_ptr.vmem [resolvable:$true] %s3011_s28 }
  0x3d   : > { %3646 = vset.pattern.permute.xlu1 %v3811_v18  ;;  %3645 = vset.pattern.permute.xlu0 %v3811_v18  ;;  %v734_v20 = vld [vmem:[%s4893_s9 + $0x68] sm:$0xff]  ;;  %v3647_v21 = vld [vmem:[%s4000_s29 + $0x38] sm:$0xff]   ;;  %v3648_v22 = vld [vmem:[%s4000_s29 + $0x30] sm:$0xff]  }
  0x3e   : > { %809 = vperm.xlu0 %3645, %v735_v16   ;;  %799 = vperm.xlu1 %3646, %v733_v17   ;;  %v732_v23 = vld [vmem:[%s4893_s9 + $0x58] sm:$0xff]  ;;  %v731_v24 = vld [vmem:[%s4893_s9 + $0x50] sm:$0xff]  ;;  %v3649_v25 = vld [vmem:[%s4000_s29 + $0x28] sm:$0xff]  }
  0x3f   : > { %3341 = vmatprep.subr.bf16.mxu0 %v3647_v21  ;;  %v730_v26 = vld [vmem:[%s4893_s9 + $0x48] sm:$0xff]  ;;  %v729_v27 = vld [vmem:[%s4893_s9 + $0x40] sm:$0xff]  ;;  %v728_v30 = vld [vmem:[%s4893_s9 + $0x38] sm:$0xff] }
  0x40   : > { %3342 = vmatpush3.bf16.msra.mxu0 %v3647_v21  ;;  %v3650_v28 = vld [vmem:[%s4000_s29 + $0x20] sm:$0xff]   ;;  %v727_v31 = vld [vmem:[%s4893_s9 + $0x30] sm:$0xff]  ;;  %v3651_v32 = vld [vmem:[%s4000_s29 + $0x18] sm:$0xff]  }
  0x41   : > { %3343 = vmatprep.subr.bf16.mxu0 %v3648_v22  ;;  %v3655_v29 = vld [vmem:[%s4894_s21] sm:$0xff]   ;;  %v726_v33 = vld [vmem:[%s4893_s9 + $0x28] sm:$0xff]  ;;  %v3652_v35 = vld [vmem:[%s4000_s29 + $0x10] sm:$0xff]  }
  0x42   : > { %814 = vperm.xlu0 %3645, %v736_v19   ;;  %804 = vperm.xlu1 %3646, %v734_v20   ;;  %v725_v34 = vld [vmem:[%s4893_s9 + $0x20] sm:$0xff]  ;;  %v724_v36 = vld [vmem:[%s4893_s9 + $0x18] sm:$0xff]  ;;  %v723_v37 = vld [vmem:[%s4893_s9 + $0x10] sm:$0xff] }
  0x43   : > { %3357 = vmatprep.mubr.bf16.mxu0 %v3655_v29  ;;  %v3653_v38 = vld [vmem:[%s4000_s29 + $0x8] sm:$0xff]   ;;  %v721_v40 = vld [vmem:[%s4893_s9] sm:$0xff]  ;;  %v1065_v42 = vld [vmem:[%s4895_s10 + $0x78] sm:$0xff] }
  0x44   : > { %3344 = vmatpush3.bf16.msra.mxu0 %v3648_v22  ;;  %v722_v39 = vld [vmem:[%s4893_s9 + $0x8] sm:$0xff]  ;;  %v3654_v41 = vld [vmem:[%s4000_s29] sm:$0xff]   ;;  %v1064_v43 = vld [vmem:[%s4895_s10 + $0x70] sm:$0xff]  ;;  %s3719_s9 = scalar_lea.vmem %s4752_s28, 2048  ;;  %s3812_s29 = smov [#allocation3]  }
  0x45   : > { %3345 = vmatprep.subr.bf16.mxu0 %v3649_v25  ;;  %v1063_v44 = vld [vmem:[%s4895_s10 + $0x68] sm:$0xff]  ;;  %v1062_v45 = vld [vmem:[%s4895_s10 + $0x60] sm:$0xff]  ;;  %v3657_v47 = vld [vmem:[%s4894_s21 + $0x10] sm:$0xff]   ;;  %p3720_p13 = scmp.ne.s32.totalorder %s4752_s28, %s3719_s9  ;;  %s3723_s1 = sshll.u32 %s3812_s29, 4  ;;  %s3724_s1 = int_to_ptr.vmem [resolvable:$false] %s3723_s1 }
  0x46   : > { %794 = vperm.xlu1 %3646, %v732_v23   ;;  %789 = vperm.xlu0 %3645, %v731_v24   ;;  %v3656_v46 = vld [vmem:[%s4894_s21 + $0x8] sm:$0xff]   ;;  %v1061_v48 = vld [vmem:[%s4895_s10 + $0x58] sm:$0xff]  ;;  %v1060_v49 = vld [vmem:[%s4895_s10 + $0x50] sm:$0xff]  ;;  %p3726_p2 = scmp.lt.s32.totalorder %s4752_s28, %s3724_s1 }
  0x47   : > { %v1059_v50 = vld [vmem:[%s4895_s10 + $0x48] sm:$0xff]  ;;  %v1058_v51 = vld [vmem:[%s4895_s10 + $0x40] sm:$0xff]  ;;  %v3658_v52 = vld [vmem:[%s4894_s21 + $0x18] sm:$0xff]   ;;  %p3721_p0 = pnand %p3720_p13, %p3950_p6 }
  0x48   : > { %3346 = vmatpush3.bf16.msra.mxu0 %v3649_v25  ;;  %v3659_v53 = vld [vmem:[%s4894_s21 + $0x20] sm:$0xff]   ;;  %v1057_v54 = vld [vmem:[%s4895_s10 + $0x38] sm:$0xff]  ;;  %v1056_v55 = vld [vmem:[%s4895_s10 + $0x30] sm:$0xff] }
  0x49   : > { %3347 = vmatprep.subr.bf16.mxu0 %v3650_v28  ;;  %v1055_v56 = vld [vmem:[%s4895_s10 + $0x28] sm:$0xff]  ;;  %v1054_v57 = vld [vmem:[%s4895_s10 + $0x20] sm:$0xff]  ;;  %v3661_v59 = vld [vmem:[%s4894_s21 + $0x30] sm:$0xff]   ;;  %p3722_p1 = pneg %p3721_p0 }
  0x4a   : > { %784 = vperm.xlu1 %3646, %v730_v26   ;;  %779 = vperm.xlu0 %3645, %v729_v27   ;;  %v3660_v58 = vld [vmem:[%s4894_s21 + $0x28] sm:$0xff]   ;;  %v1053_v60 = vld [vmem:[%s4895_s10 + $0x18] sm:$0xff]  ;;  %v1052_v61 = vld [vmem:[%s4895_s10 + $0x10] sm:$0xff] }
  0x4b   : > { %v1051_v62 = vld [vmem:[%s4895_s10 + $0x8] sm:$0xff]  ;;  %v1050_v63 = vld [vmem:[%s4895_s10] sm:$0xff]  ;;  %v3662_v0 = vld [vmem:[%s4894_s21 + $0x38] sm:$0xff]   ;;  %s4896_s10 = sld [smem:[#allocation15_spill]] }
  0x4c   : > { %3348 = vmatpush3.bf16.msra.mxu0 %v3650_v28  ;;  %v1346_v1 = vld [vmem:[%s4861_s11 + $0x78] sm:$0xff]  ;;  %v1345_v2 = vld [vmem:[%s4861_s11 + $0x70] sm:$0xff]  ;;  %v1344_v3 = vld [vmem:[%s4861_s11 + $0x68] sm:$0xff] }
  0x4d   : > { %3349 = vmatprep.subr.bf16.mxu0 %v3651_v32  ;;  %v1343_v4 = vld [vmem:[%s4861_s11 + $0x60] sm:$0xff]  ;;  %v1342_v5 = vld [vmem:[%s4861_s11 + $0x58] sm:$0xff]  ;;  %v1341_v6 = vld [vmem:[%s4861_s11 + $0x50] sm:$0xff] }
  0x4e   : > { %774 = vperm.xlu1 %3646, %v728_v30   ;;  %769 = vperm.xlu0 %3645, %v727_v31   ;;  %v1340_v7 = vld [vmem:[%s4861_s11 + $0x48] sm:$0xff]  ;;  %v1339_v8 = vld [vmem:[%s4861_s11 + $0x40] sm:$0xff]  ;;  %v1338_v9 = vld [vmem:[%s4861_s11 + $0x38] sm:$0xff] }
  0x4f   : > { %v1337_v10 = vld [vmem:[%s4861_s11 + $0x30] sm:$0xff]  ;;  %v1336_v11 = vld [vmem:[%s4861_s11 + $0x28] sm:$0xff]  ;;  %v1335_v12 = vld [vmem:[%s4861_s11 + $0x20] sm:$0xff] }
  0x50   : > { %3350 = vmatpush3.bf16.msra.mxu0 %v3651_v32  ;;  %v1334_v13 = vld [vmem:[%s4861_s11 + $0x18] sm:$0xff]  ;;  %v1333_v14 = vld [vmem:[%s4861_s11 + $0x10] sm:$0xff]  ;;  %v1332_v15 = vld [vmem:[%s4861_s11 + $0x8] sm:$0xff] }
  0x51   : > { %3351 = vmatprep.subr.bf16.mxu0 %v3652_v35  ;;  %v1331_v16 = vld [vmem:[%s4861_s11] sm:$0xff]  ;;  %v1627_v17 = vld [vmem:[%s4862_s12 + $0x78] sm:$0xff]  ;;  %v1626_v18 = vld [vmem:[%s4862_s12 + $0x70] sm:$0xff] }
  0x52   : > { %764 = vperm.xlu1 %3646, %v726_v33   ;;  %759 = vperm.xlu0 %3645, %v725_v34   ;;  %v1625_v19 = vld [vmem:[%s4862_s12 + $0x68] sm:$0xff]  ;;  %v1624_v20 = vld [vmem:[%s4862_s12 + $0x60] sm:$0xff]  ;;  %v1623_v21 = vld [vmem:[%s4862_s12 + $0x58] sm:$0xff] }
  0x53   : > { %v1622_v22 = vld [vmem:[%s4862_s12 + $0x50] sm:$0xff]  ;;  %v1621_v23 = vld [vmem:[%s4862_s12 + $0x48] sm:$0xff]  ;;  %v1620_v24 = vld [vmem:[%s4862_s12 + $0x40] sm:$0xff] }
  0x54   : > { %3352 = vmatpush3.bf16.msra.mxu0 %v3652_v35  ;;  %v1619_v25 = vld [vmem:[%s4862_s12 + $0x38] sm:$0xff]  ;;  %v1618_v26 = vld [vmem:[%s4862_s12 + $0x30] sm:$0xff]  ;;  %v1617_v27 = vld [vmem:[%s4862_s12 + $0x28] sm:$0xff] }
  0x55   : > { %3353 = vmatprep.subr.bf16.mxu0 %v3653_v38  ;;  %v1616_v28 = vld [vmem:[%s4862_s12 + $0x20] sm:$0xff]  ;;  %v1615_v29 = vld [vmem:[%s4862_s12 + $0x18] sm:$0xff]  ;;  %v1614_v30 = vld [vmem:[%s4862_s12 + $0x10] sm:$0xff] }
  0x56   : > { %754 = vperm.xlu1 %3646, %v724_v36   ;;  %749 = vperm.xlu0 %3645, %v723_v37   ;;  %v1613_v31 = vld [vmem:[%s4862_s12 + $0x8] sm:$0xff]  ;;  %v1612_v32 = vld [vmem:[%s4862_s12] sm:$0xff]  ;;  %v1908_v33 = vld [vmem:[%s4863_s13 + $0x78] sm:$0xff] }
  0x57   : > { %v1907_v34 = vld [vmem:[%s4863_s13 + $0x70] sm:$0xff]  ;;  %v1906_v35 = vld [vmem:[%s4863_s13 + $0x68] sm:$0xff]  ;;  %v1905_v36 = vld [vmem:[%s4863_s13 + $0x60] sm:$0xff] }
  0x58   : > { %3354 = vmatpush3.bf16.msra.mxu0 %v3653_v38  ;;  %v1904_v37 = vld [vmem:[%s4863_s13 + $0x58] sm:$0xff]  ;;  %v1903_v38 = vld [vmem:[%s4863_s13 + $0x50] sm:$0xff] }
  0x59   : > { %3355 = vmatprep.subr.bf16.mxu0 %v3654_v41 }
  0x5a   : > { %744 = vperm.xlu1 %3646, %v722_v39   ;;  %739 = vperm.xlu0 %3645, %v721_v40   ;;  %v1902_v39 = vld [vmem:[%s4863_s13 + $0x48] sm:$0xff]  ;;  %v1901_v40 = vld [vmem:[%s4863_s13 + $0x40] sm:$0xff] }
  0x5c   : > { %3356 = vmatpush3.bf16.msra.mxu0 %v3654_v41  ;;  %v1900_v41 = vld [vmem:[%s4863_s13 + $0x38] sm:$0xff] }
  0x5e   : > { %1143 = vperm.xlu1 %3646, %v1065_v42   ;;  %1138 = vperm.xlu0 %3645, %v1064_v43   ;;  %v1899_v42 = vld [vmem:[%s4863_s13 + $0x30] sm:$0xff]  ;;  %v1898_v43 = vld [vmem:[%s4863_s13 + $0x28] sm:$0xff] }
  0x5f   : > { %3358 = vmatmul.mubr.bf16.vlgmr.msra.gmra.mxu0 %v3656_v46  ;;  %v1895_v46 = vld [vmem:[%s4863_s13 + $0x10] sm:$0xff] }
  0x60   : > { %3361 = vmatprep.mubr.bf16.mxu0 %v3657_v47  ;;  %v1894_v47 = vld [vmem:[%s4863_s13 + $0x8] sm:$0xff] }
  0x62   : > { %1133 = vperm.xlu1 %3646, %v1063_v44   ;;  %1128 = vperm.xlu0 %3645, %v1062_v45   ;;  %v1897_v44 = vld [vmem:[%s4863_s13 + $0x20] sm:$0xff]  ;;  %v1896_v45 = vld [vmem:[%s4863_s13 + $0x18] sm:$0xff] }
  0x66   : > { %1123 = vperm.xlu1 %3646, %v1061_v48   ;;  %1118 = vperm.xlu0 %3645, %v1060_v49   ;;  %v1893_v48 = vld [vmem:[%s4863_s13] sm:$0xff]  ;;  %v2189_v49 = vld [vmem:[%s4864_s14 + $0x78] sm:$0xff] }
  0x67   : > { %3362 = vmatmul.mubr.bf16.gmra.mxu0 %v3658_v52  ;;  %v2186_v52 = vld [vmem:[%s4864_s14 + $0x60] sm:$0xff] }
  0x68   : > { %3365 = vmatprep.mubr.bf16.mxu0 %v3659_v53  ;;  %v2185_v53 = vld [vmem:[%s4864_s14 + $0x58] sm:$0xff] }
  0x6a   : > { %1113 = vperm.xlu1 %3646, %v1059_v50   ;;  %1108 = vperm.xlu0 %3645, %v1058_v51   ;;  %v2188_v50 = vld [vmem:[%s4864_s14 + $0x70] sm:$0xff]  ;;  %v2187_v51 = vld [vmem:[%s4864_s14 + $0x68] sm:$0xff] }
  0x6e   : > { %1103 = vperm.xlu1 %3646, %v1057_v54   ;;  %1098 = vperm.xlu0 %3645, %v1056_v55   ;;  %v2184_v54 = vld [vmem:[%s4864_s14 + $0x50] sm:$0xff]  ;;  %v3663_v55 = vld [vmem:[%s4896_s10] sm:$0xff]  }
  0x6f   : > { %3366 = vmatmul.mubr.bf16.gmra.mxu0 %v3660_v58  ;;  %3389 = vmatprep.mubr.bf16.mxu1 %v3663_v55  ;;  %v2183_v58 = vld [vmem:[%s4864_s14 + $0x48] sm:$0xff] }
  0x70   : > { %3369 = vmatprep.mubr.bf16.mxu0 %v3661_v59  ;;  %v2182_v59 = vld [vmem:[%s4864_s14 + $0x40] sm:$0xff]  ;;  %v2745_v55 = vld [vmem:[%s4866_s16 + $0x48] sm:$0xff] }
  0x72   : > { %1093 = vperm.xlu1 %3646, %v1055_v56   ;;  %1088 = vperm.xlu0 %3645, %v1054_v57  }
  0x76   : > { %1083 = vperm.xlu1 %3646, %v1053_v60   ;;  %1078 = vperm.xlu0 %3645, %v1052_v61   ;;  %v2181_v60 = vld [vmem:[%s4864_s14 + $0x38] sm:$0xff]  ;;  %v2180_v61 = vld [vmem:[%s4864_s14 + $0x30] sm:$0xff] }
  0x77   : > { %3370 = vmatmul.mubr.bf16.gmra.mxu0 %v3662_v0  ;;  %v2179_v0 = vld [vmem:[%s4864_s14 + $0x28] sm:$0xff] }
  0x7a   : > { %1073 = vperm.xlu1 %3646, %v1051_v62   ;;  %1068 = vperm.xlu0 %3645, %v1050_v63  }
  0x7e   : > { %1424 = vperm.xlu1 %3646, %v1346_v1   ;;  %1419 = vperm.xlu0 %3645, %v1345_v2   ;;  %v2178_v1 = vld [vmem:[%s4864_s14 + $0x20] sm:$0xff] }
  0x82   : > { %1414 = vperm.xlu1 %3646, %v1344_v3   ;;  %1409 = vperm.xlu0 %3645, %v1343_v4   ;;  %v2177_v4 = vld [vmem:[%s4864_s14 + $0x18] sm:$0xff] }
  0x86   : > { %1404 = vperm.xlu1 %3646, %v1342_v5   ;;  %1399 = vperm.xlu0 %3645, %v1341_v6   ;;  %v2176_v5 = vld [vmem:[%s4864_s14 + $0x10] sm:$0xff]  ;;  %v2175_v6 = vld [vmem:[%s4864_s14 + $0x8] sm:$0xff] }
  0x8a   : > { %1394 = vperm.xlu1 %3646, %v1340_v7   ;;  %1389 = vperm.xlu0 %3645, %v1339_v8   ;;  %v2174_v7 = vld [vmem:[%s4864_s14] sm:$0xff] }
  0x8e   : > { %1384 = vperm.xlu1 %3646, %v1338_v9   ;;  %1379 = vperm.xlu0 %3645, %v1337_v10   ;;  %v2470_v10 = vld [vmem:[%s4865_s15 + $0x78] sm:$0xff] }
  0x92   : > { %1374 = vperm.xlu1 %3646, %v1336_v11   ;;  %1369 = vperm.xlu0 %3645, %v1335_v12   ;;  %v2469_v11 = vld [vmem:[%s4865_s15 + $0x70] sm:$0xff] }
  0x96   : > { %1364 = vperm.xlu1 %3646, %v1334_v13   ;;  %1359 = vperm.xlu0 %3645, %v1333_v14   ;;  %v2468_v14 = vld [vmem:[%s4865_s15 + $0x68] sm:$0xff] }
  0x9a   : > { %1354 = vperm.xlu1 %3646, %v1332_v15   ;;  %1349 = vperm.xlu0 %3645, %v1331_v16   ;;  %v2467_v15 = vld [vmem:[%s4865_s15 + $0x60] sm:$0xff]  ;;  %v2466_v16 = vld [vmem:[%s4865_s15 + $0x58] sm:$0xff] }
  0x9e   : > { %1705 = vperm.xlu1 %3646, %v1627_v17   ;;  %1700 = vperm.xlu0 %3645, %v1626_v18   ;;  %v2465_v17 = vld [vmem:[%s4865_s15 + $0x50] sm:$0xff] }
  0xa2   : > { %1695 = vperm.xlu1 %3646, %v1625_v19   ;;  %1690 = vperm.xlu0 %3645, %v1624_v20   ;;  %v2464_v20 = vld [vmem:[%s4865_s15 + $0x48] sm:$0xff] }
  0xa6   : > { %1685 = vperm.xlu1 %3646, %v1623_v21   ;;  %1680 = vperm.xlu0 %3645, %v1622_v22   ;;  %v2463_v21 = vld [vmem:[%s4865_s15 + $0x40] sm:$0xff] }
  0xaa   : > { %1675 = vperm.xlu1 %3646, %v1621_v23   ;;  %1670 = vperm.xlu0 %3645, %v1620_v24   ;;  %v2462_v24 = vld [vmem:[%s4865_s15 + $0x38] sm:$0xff] }
  0xae   : > { %1665 = vperm.xlu1 %3646, %v1619_v25   ;;  %1660 = vperm.xlu0 %3645, %v1618_v26   ;;  %v2461_v25 = vld [vmem:[%s4865_s15 + $0x30] sm:$0xff]  ;;  %v2460_v26 = vld [vmem:[%s4865_s15 + $0x28] sm:$0xff] }
  0xb2   : > { %1655 = vperm.xlu1 %3646, %v1617_v27   ;;  %1650 = vperm.xlu0 %3645, %v1616_v28   ;;  %v2459_v27 = vld [vmem:[%s4865_s15 + $0x20] sm:$0xff] }
  0xb6   : > { %1645 = vperm.xlu1 %3646, %v1615_v29   ;;  %1640 = vperm.xlu0 %3645, %v1614_v30   ;;  %v2458_v30 = vld [vmem:[%s4865_s15 + $0x18] sm:$0xff] }
  0xb9   : > { %v4283_v56 = vpop.permute.xlu0 %809  ;;  %v4285_v57 = vpop.permute.xlu1 %799 }
  0xba   : > { %1635 = vperm.xlu1 %3646, %v1613_v31   ;;  %1630 = vperm.xlu0 %3645, %v1612_v32   ;;  %v2457_v31 = vld [vmem:[%s4865_s15 + $0x10] sm:$0xff] }
  0xbd   : > { %v4299_v62 = vpop.permute.xlu0 %814  ;;  %v4301_v63 = vpop.permute.xlu1 %804 }
  0xbe   : > { %1986 = vperm.xlu1 %3646, %v1908_v33   ;;  %1981 = vperm.xlu0 %3645, %v1907_v34   ;;  %v2456_v34 = vld [vmem:[%s4865_s15 + $0x8] sm:$0xff] }
  0xc1   : > { %v4309_v2 = vpop.permute.xlu1 %794  ;;  %v4311_v3 = vpop.permute.xlu0 %789 }
  0xc2   : > { %1976 = vperm.xlu1 %3646, %v1906_v35   ;;  %1971 = vperm.xlu0 %3645, %v1905_v36   ;;  %v2455_v35 = vld [vmem:[%s4865_s15] sm:$0xff]  ;;  %v2737_v36 = vld [vmem:[%s4866_s16 + $0x8] sm:$0xff] }
  0xc5   : > { %v4325_v8 = vpop.permute.xlu1 %784  ;;  %v4327_v9 = vpop.permute.xlu0 %779 }
  0xc6   : > { %1966 = vperm.xlu1 %3646, %v1904_v37   ;;  %1961 = vperm.xlu0 %3645, %v1903_v38   ;;  %v2736_v37 = vld [vmem:[%s4866_s16] sm:$0xff] }
  0xc9   : > { %v4335_v12 = vpop.permute.xlu1 %774  ;;  %v4337_v13 = vpop.permute.xlu0 %769 }
  0xca   : > { %1956 = vperm.xlu1 %3646, %v1902_v39   ;;  %1951 = vperm.xlu0 %3645, %v1901_v40   ;;  %v2739_v40 = vld [vmem:[%s4866_s16 + $0x18] sm:$0xff] }
  0xcd   : > { %v4351_v18 = vpop.permute.xlu1 %764  ;;  %v4353_v19 = vpop.permute.xlu0 %759 }
  0xce   : > { %1946 = vperm.xlu1 %3646, %v1900_v41   ;;  %1941 = vperm.xlu0 %3645, %v1899_v42   ;;  %v2738_v41 = vld [vmem:[%s4866_s16 + $0x10] sm:$0xff] }
  0xd1   : > { %v4361_v22 = vpop.permute.xlu1 %754  ;;  %v4363_v23 = vpop.permute.xlu0 %749 }
  0xd2   : > { %1936 = vperm.xlu1 %3646, %v1898_v43   ;;  %1931 = vperm.xlu0 %3645, %v1897_v44  }
  0xd5   : > { %v4377_v28 = vpop.permute.xlu1 %744  ;;  %v4379_v29 = vpop.permute.xlu0 %739 }
  0xd6   : > { %1926 = vperm.xlu1 %3646, %v1896_v45   ;;  %1921 = vperm.xlu0 %3645, %v1895_v46   ;;  %v2741_v45 = vld [vmem:[%s4866_s16 + $0x28] sm:$0xff]  ;;  %v2740_v46 = vld [vmem:[%s4866_s16 + $0x20] sm:$0xff] }
  0xd9   : > { %v4387_v32 = vpop.permute.xlu1 %1143  ;;  %v4389_v33 = vpop.permute.xlu0 %1138 }
  0xda   : > { %1916 = vperm.xlu1 %3646, %v1894_v47   ;;  %1911 = vperm.xlu0 %3645, %v1893_v48  }
  0xdd   : > { %v4403_v38 = vpop.permute.xlu1 %1133  ;;  %v4405_v39 = vpop.permute.xlu0 %1128 }
  0xde   : > { %2267 = vperm.xlu1 %3646, %v2189_v49   ;;  %2262 = vperm.xlu0 %3645, %v2188_v50   ;;  %v2743_v49 = vld [vmem:[%s4866_s16 + $0x38] sm:$0xff]  ;;  %v2742_v50 = vld [vmem:[%s4866_s16 + $0x30] sm:$0xff] }
  0xe1   : > { %v4413_v42 = vpop.permute.xlu1 %1123  ;;  %v4415_v43 = vpop.permute.xlu0 %1118 }
  0xe2   : > { %2257 = vperm.xlu1 %3646, %v2187_v51   ;;  %2252 = vperm.xlu0 %3645, %v2186_v52  }
  0xe5   : > { %v4435_v51 = vpop.permute.xlu1 %1113  ;;  %v4437_v52 = vpop.permute.xlu0 %1108 }
  0xe6   : > { %2247 = vperm.xlu1 %3646, %v2185_v53   ;;  %2242 = vperm.xlu0 %3645, %v2184_v54  }
  0xea   : > { %2237 = vperm.xlu1 %3646, %v2183_v58   ;;  %2232 = vperm.xlu0 %3645, %v2182_v59   ;;  %v2744_v58 = vld [vmem:[%s4866_s16 + $0x40] sm:$0xff] }
  0xee   : > { %2227 = vperm.xlu1 %3646, %v2181_v60   ;;  %2222 = vperm.xlu0 %3645, %v2180_v61   ;;  %v4447_v60 = vpop.permute.xlu1 %1103  ;;  %v4449_v61 = vpop.permute.xlu0 %1098 }
  0xf2   : > { %2217 = vperm.xlu1 %3646, %v2179_v0   ;;  %2212 = vperm.xlu0 %3645, %v2178_v1   ;;  %v2747_v1 = vld [vmem:[%s4866_s16 + $0x58] sm:$0xff] }
  0xf6   : > { %2207 = vperm.xlu1 %3646, %v2177_v4   ;;  %2202 = vperm.xlu0 %3645, %v2176_v5   ;;  %v2746_v4 = vld [vmem:[%s4866_s16 + $0x50] sm:$0xff] }
  0xfa   : > { %2197 = vperm.xlu1 %3646, %v2175_v6   ;;  %2192 = vperm.xlu0 %3645, %v2174_v7   ;;  %v2749_v7 = vld [vmem:[%s4866_s16 + $0x68] sm:$0xff] }
  0xfe   : > { %2548 = vperm.xlu1 %3646, %v2470_v10   ;;  %2543 = vperm.xlu0 %3645, %v2469_v11   ;;  %v2748_v10 = vld [vmem:[%s4866_s16 + $0x60] sm:$0xff]  ;;  %v4463_v11 = vpop.permute.xlu1 %1093 }
 0x102   : > { %2538 = vperm.xlu1 %3646, %v2468_v14   ;;  %2533 = vperm.xlu0 %3645, %v2467_v15   ;;  %v4465_v14 = vpop.permute.xlu0 %1088 }
 0x106   : > { %2528 = vperm.xlu1 %3646, %v2466_v16   ;;  %2523 = vperm.xlu0 %3645, %v2465_v17   ;;  %v2751_v17 = vld [vmem:[%s4866_s16 + $0x78] sm:$0xff] }
 0x10a   : > { %2518 = vperm.xlu1 %3646, %v2464_v20   ;;  %2513 = vperm.xlu0 %3645, %v2463_v21   ;;  %v2750_v20 = vld [vmem:[%s4866_s16 + $0x70] sm:$0xff] }
 0x10e   : > { %2508 = vperm.xlu1 %3646, %v2462_v24   ;;  %2503 = vperm.xlu0 %3645, %v2461_v25   ;;  %v4473_v24 = vpop.permute.xlu1 %1083  ;;  %v4475_v25 = vpop.permute.xlu0 %1078 }
 0x112   : > { %2498 = vperm.xlu1 %3646, %v2460_v26   ;;  %2493 = vperm.xlu0 %3645, %v2459_v27  }
 0x116   : > { %2488 = vperm.xlu1 %3646, %v2458_v30   ;;  %2483 = vperm.xlu0 %3645, %v2457_v31  }
 0x11a   : > { %2478 = vperm.xlu1 %3646, %v2456_v34   ;;  %2473 = vperm.xlu0 %3645, %v2455_v35  }
 0x11e   : > { %2759 = vperm.xlu1 %3646, %v2737_v36   ;;  %2754 = vperm.xlu0 %3645, %v2736_v37  }
 0x11f   : > { %v4417_v44 = vpop.f32.mrf.mxu0 }
 0x121   : > { %v4425_v47 = vpop.f32.mrf.mxu0 }
 0x122   : > { %2769 = vperm.xlu1 %3646, %v2739_v40   ;;  %2764 = vperm.xlu0 %3645, %v2738_v41  }
 0x123   : > { %v4427_v48 = vpop.f32.mrf.mxu0 }
 0x125   : > { %v4439_v53 = vpop.f32.mrf.mxu0 }
 0x126   : > { %2779 = vperm.xlu1 %3646, %v2741_v45   ;;  %2774 = vperm.xlu0 %3645, %v2740_v46  }
 0x127   : > { %v3363_v54 = vpop.f32.mrf.mxu0 }
 0x129   : > { %v963_v59 = vpop.f32.mrf.mxu0 }
 0x12a   : > { %2789 = vperm.xlu1 %3646, %v2743_v49   ;;  %2784 = vperm.xlu0 %3645, %v2742_v50  }
 0x12b   : > { %v3364_v0 = vpop.f32.mrf.mxu0 }
 0x12d   : > { %v966_v5 = vpop.f32.mrf.mxu0 }
 0x12e   : > { %2799 = vperm.xlu1 %3646, %v2745_v55   ;;  %2794 = vperm.xlu0 %3645, %v2744_v58  }
 0x12f   : > { %v3367_v6 = vpop.f32.mrf.mxu0 }
 0x130   : > { %v988_v46 = vadd.f32 %v3367_v6, %v4311_v3 }
 0x131   : > { %v979_v15 = vpop.f32.mrf.mxu0 }
 0x132   : > { %2809 = vperm.xlu1 %3646, %v2747_v1   ;;  %2804 = vperm.xlu0 %3645, %v2746_v4  }
 0x133   : > { %v3368_v16 = vpop.f32.mrf.mxu0 }
 0x134   : > { %v991_v37 = vadd.f32 %v3368_v16, %v4309_v2  ;;  %v975_v2 = vadd.f32 %v3364_v0, %v4335_v12 }
 0x135   : > { %v982_v21 = vpop.f32.mrf.mxu0 }
 0x136   : > { %2819 = vperm.xlu1 %3646, %v2749_v7   ;;  %2814 = vperm.xlu0 %3645, %v2748_v10   ;;  %v1021_v58 = vmax.f32 %v991_v37, 0.0  ;;  %v1017_v6 = vmax.f32 %v975_v2, 0.0  ;;  %v967_v10 = vadd.f32 %v966_v5, %v4351_v18  ;;  %v951_v18 = vadd.f32 %v4439_v53, %v4377_v28  ;;  %v3665_v28 = vld [vmem:[%s4896_s10 + $0x10] sm:$0xff]  }
 0x137   : > { %v3371_v26 = vpop.f32.mrf.mxu0  ;;  %v3669_v53 = vld [vmem:[%s4896_s10 + $0x30] sm:$0xff]  }
 0x138   : > { %v1004_v30 = vadd.f32 %v3371_v26, %v4283_v56  ;;  %v983_v56 = vadd.f32 %v982_v21, %v4325_v8  ;;  %v1015_v0 = vmax.f32 %v967_v10, 0.0  ;;  %v3670_v26 = vld [vmem:[%s4896_s10 + $0x38] sm:$0xff]  }
 0x139   : > { %v995_v27 = vpop.f32.mrf.mxu0 }
 0x13a   : > { %2829 = vperm.xlu1 %3646, %v2751_v17   ;;  %2824 = vperm.xlu0 %3645, %v2750_v20   ;;  %v996_v34 = vadd.f32 %v995_v27, %v4285_v57  ;;  %v1024_v40 = vmax.f32 %v1004_v30, 0.0  ;;  %v1020_v57 = vmax.f32 %v988_v46, 0.0  ;;  %v1019_v7 = vmax.f32 %v983_v56, 0.0  ;;  %v3671_v27 = vld [vmem:[%s4897_s3] sm:$0xff]  }
 0x13b   : > { %v3372_v31 = vpop.f32.mrf.mxu0  ;;  %v964_v17 = vadd.f32 %v963_v59, %v4353_v19  ;;  %v948_v19 = vadd.f32 %v4425_v47, %v4379_v29  ;;  %v3666_v29 = vld [vmem:[%s4896_s10 + $0x18] sm:$0xff]   ;;  %v3668_v47 = vld [vmem:[%s4896_s10 + $0x28] sm:$0xff]   ;;  %3421 = vmatprep.mubr.bf16.mxu0 %v3671_v27  ;;  %v3677_v27 = vld [vmem:[%s4897_s3 + $0x30] sm:$0xff]  }
 0x13c   : > { %v1007_v35 = vadd.f32 %v3372_v31, %v4299_v62  ;;  %v1022_v49 = vmax.f32 %v996_v34, 0.0  ;;  %v980_v62 = vadd.f32 %v979_v15, %v4327_v9  ;;  %v1031_v4 = vpack.c.bf16 %v1021_v58, %v1020_v57 }
 0x13d   : > { %v998_v36 = vpop.f32.mrf.mxu0  ;;  %v959_v9 = vadd.f32 %v4427_v48, %v4361_v22  ;;  %v1011_v48 = vmax.f32 %v951_v18, 0.0  ;;  %v1010_v59 = vmax.f32 %v948_v19, 0.0 }
 0x13e   : > { %v1025_v41 = vmax.f32 %v1007_v35, 0.0  ;;  %v999_v45 = vadd.f32 %v998_v36, %v4301_v63  ;;  %v972_v63 = vadd.f32 %v3363_v54, %v4337_v13  ;;  %v1018_v3 = vmax.f32 %v980_v62, 0.0 }
 0x13f   : > { %v956_v13 = vadd.f32 %v4417_v44, %v4363_v23  ;;  %v1014_v54 = vmax.f32 %v964_v17, 0.0  ;;  %v1013_v15 = vmax.f32 %v959_v9, 0.0  ;;  %v1026_v21 = vpack.c.bf16 %v1011_v48, %v1010_v59  ;;  %v3664_v23 = vld [vmem:[%s4896_s10 + $0x8] sm:$0xff]   ;;  %v3667_v44 = vld [vmem:[%s4896_s10 + $0x20] sm:$0xff]  }
 0x140   : > { %v1023_v50 = vmax.f32 %v999_v45, 0.0  ;;  %v1033_v55 = vpack.c.bf16 %v1025_v41, %v1024_v40  ;;  %v1030_v8 = vpack.c.bf16 %v1019_v7, %v1018_v3  ;;  %v1016_v16 = vmax.f32 %v972_v63, 0.0 }
 0x141   : > { %v1028_v5 = vpack.c.bf16 %v1015_v0, %v1014_v54  ;;  %v1012_v20 = vmax.f32 %v956_v13, 0.0 }
 0x142   : > { %v1032_v1 = vpack.c.bf16 %v1023_v50, %v1022_v49  ;;  %3373 = vmatprep.subr.bf16.mxu1 %v1033_v55  ;;  %v1029_v12 = vpack.c.bf16 %v1017_v6, %v1016_v16 }
 0x143   : > { %3374 = vmatpush3.bf16.msra.mxu1 %v1033_v55  ;;  %v1027_v22 = vpack.c.bf16 %v1013_v15, %v1012_v20 }
 0x144   : > { %3375 = vmatprep.subr.bf16.mxu1 %v1032_v1 }
 0x147   : > { %3376 = vmatpush3.bf16.msra.mxu1 %v1032_v1 }
 0x148   : > { %3377 = vmatprep.subr.bf16.mxu1 %v1031_v4 }
 0x14b   : > { %3378 = vmatpush3.bf16.msra.mxu1 %v1031_v4 }
 0x14c   : > { %3379 = vmatprep.subr.bf16.mxu1 %v1030_v8 }
 0x14f   : > { %3380 = vmatpush3.bf16.msra.mxu1 %v1030_v8 }
 0x150   : > { %3381 = vmatprep.subr.bf16.mxu1 %v1029_v12 }
 0x153   : > { %3382 = vmatpush3.bf16.msra.mxu1 %v1029_v12 }
 0x154   : > { %3383 = vmatprep.subr.bf16.mxu1 %v1028_v5 }
 0x157   : > { %3384 = vmatpush3.bf16.msra.mxu1 %v1028_v5 }
 0x158   : > { %3385 = vmatprep.subr.bf16.mxu1 %v1027_v22 }
 0x15b   : > { %3386 = vmatpush3.bf16.msra.mxu1 %v1027_v22 }
 0x15c   : > { %3387 = vmatprep.subr.bf16.mxu1 %v1026_v21 }
 0x15f   : > { %3388 = vmatpush3.bf16.msra.mxu1 %v1026_v21 }
 0x162   : > { %3390 = vmatmul.mubr.bf16.vlgmr.msra.gmra.mxu1 %v3664_v23 }
 0x163   : > { %3393 = vmatprep.mubr.bf16.mxu1 %v3665_v28 }
 0x16a   : > { %3394 = vmatmul.mubr.bf16.gmra.mxu1 %v3666_v29 }
 0x16b   : > { %3397 = vmatprep.mubr.bf16.mxu1 %v3667_v44  ;;  %v3673_v44 = vld [vmem:[%s4897_s3 + $0x10] sm:$0xff]  }
 0x172   : > { %3398 = vmatmul.mubr.bf16.gmra.mxu1 %v3668_v47  ;;  %v3674_v47 = vld [vmem:[%s4897_s3 + $0x18] sm:$0xff]  }
 0x173   : > { %3401 = vmatprep.mubr.bf16.mxu1 %v3669_v53  ;;  %v3675_v53 = vld [vmem:[%s4897_s3 + $0x20] sm:$0xff]  }
 0x17a   : > { %3402 = vmatmul.mubr.bf16.gmra.mxu1 %v3670_v26  ;;  %v3676_v26 = vld [vmem:[%s4897_s3 + $0x28] sm:$0xff]  }
 0x222   : > { %v3391_v30 = vpop.f32.mrf.mxu1 }
 0x223   : > { %v1237_v20 = vadd.f32 %v3391_v30, %v4475_v25  ;;  %v3672_v25 = vld [vmem:[%s4897_s3 + $0x8] sm:$0xff]   ;;  %v3678_v30 = vld [vmem:[%s4897_s3 + $0x38] sm:$0xff]   ;;  %s4750_s3 = scalar_lea.hbm %s4867_s17, %s4743_s0 }
 0x224   : > { %v1228_v31 = vpop.f32.mrf.mxu1 }
 0x225   : > { %v1293_v21 = vmax.f32 %v1237_v20, 0.0 }
 0x226   : > { %v3392_v34 = vpop.f32.mrf.mxu1 }
 0x228   : > { %v1231_v35 = vpop.f32.mrf.mxu1 }
 0x22a   : > { %v3395_v36 = vpop.f32.mrf.mxu1 }
 0x22c   : > { %v1244_v37 = vpop.f32.mrf.mxu1 }
 0x22d   : > { %v1245_v18 = vadd.f32 %v1244_v37, %v4465_v14 }
 0x22e   : > { %v3396_v40 = vpop.f32.mrf.mxu1 }
 0x22f   : > { %v1295_v19 = vmax.f32 %v1245_v18, 0.0 }
 0x230   : > { %v1247_v41 = vpop.f32.mrf.mxu1 }
 0x231   : > { %v1248_v54 = vadd.f32 %v1247_v41, %v4463_v11  ;;  %v1069_v11 = vpop.permute.xlu0 %1068 }
 0x232   : > { %v3399_v45 = vpop.f32.mrf.mxu1  ;;  %v1229_v23 = vadd.f32 %v1228_v31, %v1069_v11  ;;  %v3679_v31 = vld [vmem:[%s4898_s4] sm:$0xff]  }
 0x233   : > { %v1269_v6 = vadd.f32 %v3399_v45, %v4415_v43  ;;  %3453 = vmatprep.mubr.bf16.mxu1 %v3679_v31 }
 0x234   : > { %v1260_v46 = vpop.f32.mrf.mxu1 }
 0x235   : > { %v1420_v45 = vpop.permute.xlu0 %1419 }
 0x236   : > { %v3400_v49 = vpop.f32.mrf.mxu1 }
 0x237   : > { %v1272_v4 = vadd.f32 %v3400_v49, %v4413_v42  ;;  %v1256_v42 = vadd.f32 %v3396_v40, %v4447_v60  ;;  %v1296_v60 = vmax.f32 %v1248_v54, 0.0 }
 0x238   : > { %v1263_v50 = vpop.f32.mrf.mxu1 }
 0x239   : > { %v1302_v17 = vmax.f32 %v1272_v4, 0.0  ;;  %v1298_v13 = vmax.f32 %v1256_v42, 0.0  ;;  %v1309_v59 = vpack.c.bf16 %v1296_v60, %v1295_v19 }
 0x23a   : > { %v3403_v55 = vpop.f32.mrf.mxu1 }
 0x23b   : > { %v1285_v56 = vadd.f32 %v3403_v55, %v4389_v33  ;;  %v1264_v33 = vadd.f32 %v1263_v50, %v4435_v51 }
 0x23c   : > { %v1276_v58 = vpop.f32.mrf.mxu1 }
 0x23d   : > { %v1277_v57 = vadd.f32 %v1276_v58, %v4405_v39  ;;  %v1305_v7 = vmax.f32 %v1285_v56, 0.0  ;;  %v1301_v39 = vmax.f32 %v1269_v6, 0.0  ;;  %v1300_v0 = vmax.f32 %v1264_v33, 0.0  ;;  %v1410_v58 = vpop.permute.xlu0 %1409 }
 0x23e   : > { %v3404_v1 = vpop.f32.mrf.mxu1 }
 0x23f   : > { %v1288_v62 = vadd.f32 %v3404_v1, %v4387_v32  ;;  %v1303_v10 = vmax.f32 %v1277_v57, 0.0  ;;  %v1261_v32 = vadd.f32 %v1260_v46, %v4437_v52  ;;  %v1312_v12 = vpack.c.bf16 %v1302_v17, %v1301_v39 }
 0x240   : > { %v1279_v2 = vpop.f32.mrf.mxu1  ;;  %v1240_v52 = vadd.f32 %v3392_v34, %v4473_v24  ;;  %v1291_v24 = vmax.f32 %v1229_v23, 0.0 }
 0x241   : > { %v1306_v63 = vmax.f32 %v1288_v62, 0.0  ;;  %v1280_v3 = vadd.f32 %v1279_v2, %v4403_v38  ;;  %v1253_v38 = vadd.f32 %v3395_v36, %v4449_v61  ;;  %v1299_v43 = vmax.f32 %v1261_v32, 0.0  ;;  %v1074_v61 = vpop.permute.xlu1 %1073  ;;  %v1400_v2 = vpop.permute.xlu0 %1399 }
 0x242   : > { %v1294_v22 = vmax.f32 %v1240_v52, 0.0  ;;  %v1232_v48 = vadd.f32 %v1231_v35, %v1074_v61 }
 0x243   : > { %v1314_v8 = vpack.c.bf16 %v1306_v63, %v1305_v7  ;;  %v1304_v16 = vmax.f32 %v1280_v3, 0.0  ;;  %v1311_v51 = vpack.c.bf16 %v1300_v0, %v1299_v43  ;;  %v1297_v15 = vmax.f32 %v1253_v38, 0.0 }
 0x244   : > { %v1308_v14 = vpack.c.bf16 %v1294_v22, %v1293_v21  ;;  %v1292_v28 = vmax.f32 %v1232_v48, 0.0 }
 0x245   : > { %v1313_v9 = vpack.c.bf16 %v1304_v16, %v1303_v10  ;;  %3405 = vmatprep.subr.bf16.mxu0 %v1314_v8  ;;  %v1310_v5 = vpack.c.bf16 %v1298_v13, %v1297_v15  ;;  %v1425_v40 = vpop.permute.xlu1 %1424  ;;  %v1390_v10 = vpop.permute.xlu0 %1389 }
 0x246   : > { %3406 = vmatpush3.bf16.msra.mxu0 %v1314_v8  ;;  %v1307_v29 = vpack.c.bf16 %v1292_v28, %v1291_v24 }
 0x247   : > { %3407 = vmatprep.subr.bf16.mxu0 %v1313_v9 }
 0x249   : > { %v1415_v50 = vpop.permute.xlu1 %1414  ;;  %v1380_v54 = vpop.permute.xlu0 %1379 }
 0x24a   : > { %3408 = vmatpush3.bf16.msra.mxu0 %v1313_v9 }
 0x24b   : > { %3409 = vmatprep.subr.bf16.mxu0 %v1312_v12 }
 0x24d   : > { %v1405_v57 = vpop.permute.xlu1 %1404  ;;  %v1370_v22 = vpop.permute.xlu0 %1369 }
 0x24e   : > { %3410 = vmatpush3.bf16.msra.mxu0 %v1312_v12 }
 0x24f   : > { %3411 = vmatprep.subr.bf16.mxu0 %v1311_v51 }
 0x251   : > { %v1395_v63 = vpop.permute.xlu1 %1394 }
 0x252   : > { %3412 = vmatpush3.bf16.msra.mxu0 %v1311_v51 }
 0x253   : > { %3413 = vmatprep.subr.bf16.mxu0 %v1310_v5 }
 0x255   : > { %v1385_v12 = vpop.permute.xlu1 %1384 }
 0x256   : > { %3414 = vmatpush3.bf16.msra.mxu0 %v1310_v5 }
 0x257   : > { %3415 = vmatprep.subr.bf16.mxu0 %v1309_v59 }
 0x259   : > { %v1375_v60 = vpop.permute.xlu1 %1374 }
 0x25a   : > { %3416 = vmatpush3.bf16.msra.mxu0 %v1309_v59 }
 0x25b   : > { %3417 = vmatprep.subr.bf16.mxu0 %v1308_v14 }
 0x25e   : > { %3418 = vmatpush3.bf16.msra.mxu0 %v1308_v14  ;;  %v1365_v14 = vpop.permute.xlu1 %1364 }
 0x25f   : > { %3419 = vmatprep.subr.bf16.mxu0 %v1307_v29 }
 0x262   : > { %3420 = vmatpush3.bf16.msra.mxu0 %v1307_v29  ;;  %v1360_v29 = vpop.permute.xlu0 %1359 }
 0x265   : > { %3422 = vmatmul.mubr.bf16.vlgmr.msra.gmra.mxu0 %v3672_v25 }
 0x266   : > { %3425 = vmatprep.mubr.bf16.mxu0 %v3673_v44 }
 0x26d   : > { %3426 = vmatmul.mubr.bf16.gmra.mxu0 %v3674_v47 }
 0x26e   : > { %3429 = vmatprep.mubr.bf16.mxu0 %v3675_v53 }
 0x275   : > { %3430 = vmatmul.mubr.bf16.gmra.mxu0 %v3676_v26 }
 0x276   : > { %3433 = vmatprep.mubr.bf16.mxu0 %v3677_v27  ;;  %v1355_v27 = vpop.permute.xlu1 %1354 }
 0x27d   : > { %3434 = vmatmul.mubr.bf16.gmra.mxu0 %v3678_v30 }
 0x325   : > { %v4559_v34 = vpop.f32.mrf.mxu0 }
 0x326   : > { %v1518_v53 = vadd.f32 %v4559_v34, %v1360_v29  ;;  %v3680_v34 = vld [vmem:[%s4898_s4 + $0x8] sm:$0xff]  }
 0x327   : > { %v4561_v35 = vpop.f32.mrf.mxu0 }
 0x329   : > { %v3424_v36 = vpop.f32.mrf.mxu0 }
 0x32a   : > { %v1521_v25 = vadd.f32 %v3424_v36, %v1365_v14 }
 0x32b   : > { %v4563_v37 = vpop.f32.mrf.mxu0 }
 0x32c   : > { %v1575_v30 = vmax.f32 %v1521_v25, 0.0  ;;  %v1513_v31 = vadd.f32 %v4563_v37, %v1355_v27  ;;  %v3681_v37 = vld [vmem:[%s4898_s4 + $0x10] sm:$0xff]  }
 0x32d   : > { %v3427_v41 = vpop.f32.mrf.mxu0 }
 0x32e   : > { %v1534_v48 = vadd.f32 %v3427_v41, %v1380_v54  ;;  %v1350_v41 = vpop.permute.xlu0 %1349  ;;  %v1573_v36 = vmax.f32 %v1513_v31, 0.0 }
 0x32f   : > { %v1525_v46 = vpop.f32.mrf.mxu0 }
 0x330   : > { %v1578_v28 = vmax.f32 %v1534_v48, 0.0  ;;  %v1526_v24 = vadd.f32 %v1525_v46, %v1370_v22  ;;  %v1510_v46 = vadd.f32 %v4561_v35, %v1350_v41  ;;  %v3682_v35 = vld [vmem:[%s4898_s4 + $0x18] sm:$0xff]  }
 0x331   : > { %v3428_v49 = vpop.f32.mrf.mxu0 }
 0x332   : > { %v1537_v20 = vadd.f32 %v3428_v49, %v1385_v12  ;;  %v1576_v26 = vmax.f32 %v1526_v24, 0.0 }
 0x333   : > { %v1528_v55 = vpop.f32.mrf.mxu0 }
 0x334   : > { %v1579_v11 = vmax.f32 %v1537_v20, 0.0  ;;  %v1529_v21 = vadd.f32 %v1528_v55, %v1375_v60 }
 0x335   : > { %v3431_v56 = vpop.f32.mrf.mxu0 }
 0x336   : > { %v1550_v0 = vadd.f32 %v3431_v56, %v1400_v2  ;;  %v1591_v44 = vpack.c.bf16 %v1579_v11, %v1578_v28  ;;  %v1577_v47 = vmax.f32 %v1529_v21, 0.0  ;;  %v3684_v56 = vld [vmem:[%s4898_s4 + $0x28] sm:$0xff]   ;;  %v1701_v2 = vpop.permute.xlu0 %1700 }
 0x337   : > { %v1541_v1 = vpop.f32.mrf.mxu0 }
 0x338   : > { %v1582_v52 = vmax.f32 %v1550_v0, 0.0  ;;  %v1542_v5 = vadd.f32 %v1541_v1, %v1390_v10  ;;  %v3685_v1 = vld [vmem:[%s4898_s4 + $0x30] sm:$0xff]  }
 0x339   : > { %v3432_v62 = vpop.f32.mrf.mxu0 }
 0x33a   : > { %v1553_v9 = vadd.f32 %v3432_v62, %v1405_v57  ;;  %v1580_v59 = vmax.f32 %v1542_v5, 0.0  ;;  %v3686_v57 = vld [vmem:[%s4898_s4 + $0x38] sm:$0xff]   ;;  %v3687_v62 = vld [vmem:[%s4855_s5] sm:$0xff]  }
 0x33b   : > { %v1544_v4 = vpop.f32.mrf.mxu0  ;;  %3485 = vmatprep.mubr.bf16.mxu0 %v3687_v62  ;;  %v3695_v62 = vld [vmem:[%s4856_s6] sm:$0xff]  }
 0x33c   : > { %v1583_v51 = vmax.f32 %v1553_v9, 0.0  ;;  %v1545_v15 = vadd.f32 %v1544_v4, %v1395_v63  ;;  %v1706_v4 = vpop.permute.xlu1 %1705 }
 0x33d   : > { %v3435_v7 = vpop.f32.mrf.mxu0 }
 0x33e   : > { %v1566_v6 = vadd.f32 %v3435_v7, %v1420_v45  ;;  %v1593_v19 = vpack.c.bf16 %v1583_v51, %v1582_v52  ;;  %v1581_v61 = vmax.f32 %v1545_v15, 0.0  ;;  %v1574_v45 = vmax.f32 %v1518_v53, 0.0  ;;  %v1691_v7 = vpop.permute.xlu0 %1690 }
 0x33f   : > { %v1557_v3 = vpop.f32.mrf.mxu0 }
 0x340   : > { %v1558_v16 = vadd.f32 %v1557_v3, %v1410_v58  ;;  %v1586_v39 = vmax.f32 %v1566_v6, 0.0  ;;  %v1592_v23 = vpack.c.bf16 %v1581_v61, %v1580_v59  ;;  %v1589_v49 = vpack.c.bf16 %v1575_v30, %v1574_v45  ;;  %v3683_v58 = vld [vmem:[%s4898_s4 + $0x20] sm:$0xff]   ;;  %v1696_v63 = vpop.permute.xlu1 %1695 }
 0x341   : > { %v3436_v8 = vpop.f32.mrf.mxu0 }
 0x342   : > { %v1569_v17 = vadd.f32 %v3436_v8, %v1425_v40  ;;  %v1584_v38 = vmax.f32 %v1558_v16, 0.0  ;;  %v1590_v40 = vpack.c.bf16 %v1577_v47, %v1576_v26  ;;  %v1681_v3 = vpop.permute.xlu0 %1680 }
 0x343   : > { %v1560_v33 = vpop.f32.mrf.mxu0 }
 0x344   : > { %v1587_v32 = vmax.f32 %v1569_v17, 0.0  ;;  %v1561_v42 = vadd.f32 %v1560_v33, %v1415_v50  ;;  %v1572_v50 = vmax.f32 %v1510_v46, 0.0  ;;  %v1686_v6 = vpop.permute.xlu1 %1685 }
 0x346   : > { %v1595_v43 = vpack.c.bf16 %v1587_v32, %v1586_v39  ;;  %v1585_v13 = vmax.f32 %v1561_v42, 0.0  ;;  %v1588_v55 = vpack.c.bf16 %v1573_v36, %v1572_v50  ;;  %v1671_v10 = vpop.permute.xlu0 %1670 }
 0x348   : > { %v1594_v18 = vpack.c.bf16 %v1585_v13, %v1584_v38  ;;  %3437 = vmatprep.subr.bf16.mxu1 %v1595_v43  ;;  %v1676_v8 = vpop.permute.xlu1 %1675 }
 0x349   : > { %3438 = vmatpush3.bf16.msra.mxu1 %v1595_v43 }
 0x34a   : > { %3439 = vmatprep.subr.bf16.mxu1 %v1594_v18  ;;  %v1661_v16 = vpop.permute.xlu0 %1660 }
 0x34c   : > { %v1666_v17 = vpop.permute.xlu1 %1665 }
 0x34d   : > { %3440 = vmatpush3.bf16.msra.mxu1 %v1594_v18 }
 0x34e   : > { %3441 = vmatprep.subr.bf16.mxu1 %v1593_v19  ;;  %v1651_v33 = vpop.permute.xlu0 %1650 }
 0x350   : > { %v1656_v9 = vpop.permute.xlu1 %1655 }
 0x351   : > { %3442 = vmatpush3.bf16.msra.mxu1 %v1593_v19 }
 0x352   : > { %3443 = vmatprep.subr.bf16.mxu1 %v1592_v23  ;;  %v1641_v39 = vpop.permute.xlu0 %1640 }
 0x354   : > { %v1646_v32 = vpop.permute.xlu1 %1645 }
 0x355   : > { %3444 = vmatpush3.bf16.msra.mxu1 %v1592_v23 }
 0x356   : > { %3445 = vmatprep.subr.bf16.mxu1 %v1591_v44  ;;  %v1631_v0 = vpop.permute.xlu0 %1630 }
 0x358   : > { %v1636_v51 = vpop.permute.xlu1 %1635 }
 0x359   : > { %3446 = vmatpush3.bf16.msra.mxu1 %v1591_v44 }
 0x35a   : > { %3447 = vmatprep.subr.bf16.mxu1 %v1590_v40 }
 0x35d   : > { %3448 = vmatpush3.bf16.msra.mxu1 %v1590_v40 }
 0x35e   : > { %3449 = vmatprep.subr.bf16.mxu1 %v1589_v49 }
 0x361   : > { %3450 = vmatpush3.bf16.msra.mxu1 %v1589_v49 }
 0x362   : > { %3451 = vmatprep.subr.bf16.mxu1 %v1588_v55 }
 0x365   : > { %3452 = vmatpush3.bf16.msra.mxu1 %v1588_v55 }
 0x368   : > { %3454 = vmatmul.mubr.bf16.vlgmr.msra.gmra.mxu1 %v3680_v34  ;;  %v3688_v34 = vld [vmem:[%s4855_s5 + $0x8] sm:$0xff]  }
 0x369   : > { %3457 = vmatprep.mubr.bf16.mxu1 %v3681_v37  ;;  %v3689_v37 = vld [vmem:[%s4855_s5 + $0x10] sm:$0xff]  }
 0x370   : > { %3458 = vmatmul.mubr.bf16.gmra.mxu1 %v3682_v35  ;;  %v3690_v35 = vld [vmem:[%s4855_s5 + $0x18] sm:$0xff]  }
 0x371   : > { %3461 = vmatprep.mubr.bf16.mxu1 %v3683_v58  ;;  %v3691_v58 = vld [vmem:[%s4855_s5 + $0x20] sm:$0xff]  }
 0x378   : > { %3462 = vmatmul.mubr.bf16.gmra.mxu1 %v3684_v56  ;;  %v3692_v56 = vld [vmem:[%s4855_s5 + $0x28] sm:$0xff]  }
 0x379   : > { %3465 = vmatprep.mubr.bf16.mxu1 %v3685_v1  ;;  %v3693_v1 = vld [vmem:[%s4855_s5 + $0x30] sm:$0xff]  }
 0x380   : > { %3466 = vmatmul.mubr.bf16.gmra.mxu1 %v3686_v57  ;;  %v3694_v57 = vld [vmem:[%s4855_s5 + $0x38] sm:$0xff]  }
 0x381   : > { %3517 = vmatprep.mubr.bf16.mxu1 %v3695_v62 }
 0x428   : > { %v3455_v42 = vpop.f32.mrf.mxu1 }
 0x429   : > { %v4593_v12 = vadd.f32 %v3455_v42, %v1641_v39 }
 0x42a   : > { %v1790_v38 = vpop.f32.mrf.mxu1 }
 0x42b   : > { %1855 = vst [vmem:[%s4597_s26 + $0x10] sm:$0xff] %v4593_v12  ;;  %v4601_v43 = vadd.f32 %v1790_v38, %v1631_v0 }
 0x42c   : > { %v3456_v13 = vpop.f32.mrf.mxu1 }
 0x42d   : > { %1853 = vst [vmem:[%s4597_s26] sm:$0xff] %v4601_v43  ;;  %v1802_v54 = vadd.f32 %v3456_v13, %v1646_v32 }
 0x42e   : > { %v1793_v15 = vpop.f32.mrf.mxu1 }
 0x42f   : > { %1856 = vst [vmem:[%s4597_s26 + $0x18] sm:$0xff] %v1802_v54  ;;  %v1794_v18 = vadd.f32 %v1793_v15, %v1636_v51  ;;  %v1870_v50 = vpack.c.bf16 %v1802_v54, %v4593_v12 }
 0x430   : > { %v3459_v52 = vpop.f32.mrf.mxu1 }
 0x431   : > { %1854 = vst [vmem:[%s4597_s26 + $0x8] sm:$0xff] %v1794_v18  ;;  %v1815_v5 = vadd.f32 %v3459_v52, %v1661_v16  ;;  %v1869_v55 = vpack.c.bf16 %v1794_v18, %v4601_v43 }
 0x432   : > { %v1806_v60 = vpop.f32.mrf.mxu1 }
 0x433   : > { %1859 = vst [vmem:[%s4597_s26 + $0x30] sm:$0xff] %v1815_v5  ;;  %v1807_v20 = vadd.f32 %v1806_v60, %v1651_v33 }
 0x434   : > { %v3460_v19 = vpop.f32.mrf.mxu1 }
 0x435   : > { %1857 = vst [vmem:[%s4597_s26 + $0x20] sm:$0xff] %v1807_v20  ;;  %v1818_v61 = vadd.f32 %v3460_v19, %v1666_v17 }
 0x436   : > { %v1809_v22 = vpop.f32.mrf.mxu1 }
 0x437   : > { %1860 = vst [vmem:[%s4597_s26 + $0x38] sm:$0xff] %v1818_v61  ;;  %v1810_v48 = vadd.f32 %v1809_v22, %v1656_v9  ;;  %v1872_v49 = vpack.c.bf16 %v1818_v61, %v1815_v5 }
 0x438   : > { %v3463_v59 = vpop.f32.mrf.mxu1 }
 0x439   : > { %1858 = vst [vmem:[%s4597_s26 + $0x28] sm:$0xff] %v1810_v48  ;;  %v1831_v11 = vadd.f32 %v3463_v59, %v1681_v3  ;;  %v1871_v36 = vpack.c.bf16 %v1810_v48, %v1807_v20  ;;  %v1987_v3 = vpop.permute.xlu1 %1986 }
 0x43a   : > { %v1822_v21 = vpop.f32.mrf.mxu1 }
 0x43b   : > { %1863 = vst [vmem:[%s4597_s26 + $0x50] sm:$0xff] %v1831_v11  ;;  %v1823_v23 = vadd.f32 %v1822_v21, %v1671_v10  ;;  %v1982_v10 = vpop.permute.xlu0 %1981 }
 0x43c   : > { %v3464_v14 = vpop.f32.mrf.mxu1 }
 0x43d   : > { %1861 = vst [vmem:[%s4597_s26 + $0x40] sm:$0xff] %v1823_v23  ;;  %v1834_v28 = vadd.f32 %v3464_v14, %v1686_v6  ;;  %v1977_v17 = vpop.permute.xlu1 %1976 }
 0x43e   : > { %v1825_v24 = vpop.f32.mrf.mxu1 }
 0x43f   : > { %1864 = vst [vmem:[%s4597_s26 + $0x58] sm:$0xff] %v1834_v28  ;;  %v1826_v29 = vadd.f32 %v1825_v24, %v1676_v8  ;;  %v1874_v45 = vpack.c.bf16 %v1834_v28, %v1831_v11  ;;  %v1972_v9 = vpop.permute.xlu0 %1971 }
 0x440   : > { %v3467_v25 = vpop.f32.mrf.mxu1 }
 0x441   : > { %1862 = vst [vmem:[%s4597_s26 + $0x48] sm:$0xff] %v1826_v29  ;;  %v1847_v44 = vadd.f32 %v3467_v25, %v1701_v2  ;;  %v1873_v46 = vpack.c.bf16 %v1826_v29, %v1823_v23  ;;  %v1967_v42 = vpop.permute.xlu1 %1966 }
 0x442   : > { %v1838_v47 = vpop.f32.mrf.mxu1 }
 0x443   : > { %1867 = vst [vmem:[%s4597_s26 + $0x70] sm:$0xff] %v1847_v44  ;;  %v1839_v53 = vadd.f32 %v1838_v47, %v1691_v7  ;;  %v1962_v0 = vpop.permute.xlu0 %1961 }
 0x444   : > { %v3468_v26 = vpop.f32.mrf.mxu1 }
 0x445   : > { %1865 = vst [vmem:[%s4597_s26 + $0x60] sm:$0xff] %v1839_v53  ;;  %v1850_v27 = vadd.f32 %v3468_v26, %v1706_v4  ;;  %v1957_v13 = vpop.permute.xlu1 %1956 }
 0x446   : > { %v1841_v30 = vpop.f32.mrf.mxu1 }
 0x447   : > { %1868 = vst [vmem:[%s4597_s26 + $0x78] sm:$0xff] %v1850_v27  ;;  %v1876_v31 = vpack.c.bf16 %v1850_v27, %v1847_v44  ;;  %v1842_v40 = vadd.f32 %v1841_v30, %v1696_v63  ;;  %v1952_v15 = vpop.permute.xlu0 %1951 }
 0x449   : > { %1866 = vst [vmem:[%s4597_s26 + $0x68] sm:$0xff] %v1842_v40  ;;  %v1875_v41 = vpack.c.bf16 %v1842_v40, %v1839_v53  ;;  %3469 = vmatprep.subr.bf16.mxu0 %v1876_v31  ;;  %v1947_v48 = vpop.permute.xlu1 %1946  ;;  %s3725_s26 = scalar_lea.vmem %s3724_s1, 4096 }
 0x44a   : > { %3470 = vmatpush3.bf16.msra.mxu0 %v1876_v31  ;;  %p3727_p3 = scmp.lt.s32.totalorder %s3725_s26, %s3719_s9 }
 0x44b   : > { %3471 = vmatprep.subr.bf16.mxu0 %v1875_v41  ;;  %v1942_v14 = vpop.permute.xlu0 %1941 }
 0x44c   : > { %p3728_p4 = por %p3727_p3, %p3726_p2 }
 0x44d   : > { %v1937_v47 = vpop.permute.xlu1 %1936 }
 0x44e   : > { %3472 = vmatpush3.bf16.msra.mxu0 %v1875_v41  ;;  %p3729_p5 = pnand %p3728_p4, %p3722_p1 }
 0x44f   : > { %3473 = vmatprep.subr.bf16.mxu0 %v1874_v45  ;;  %v1932_v30 = vpop.permute.xlu0 %1931 }
 0x452   : > { %3474 = vmatpush3.bf16.msra.mxu0 %v1874_v45 }
 0x453   : > { %3475 = vmatprep.subr.bf16.mxu0 %v1873_v46 }
 0x456   : > { %3476 = vmatpush3.bf16.msra.mxu0 %v1873_v46 }
 0x457   : > { %3477 = vmatprep.subr.bf16.mxu0 %v1872_v49 }
 0x45a   : > { %3478 = vmatpush3.bf16.msra.mxu0 %v1872_v49  ;;  %v1927_v49 = vpop.permute.xlu1 %1926 }
 0x45b   : > { %3479 = vmatprep.subr.bf16.mxu0 %v1871_v36 }
 0x45e   : > { %3480 = vmatpush3.bf16.msra.mxu0 %v1871_v36 }
 0x45f   : > { %3481 = vmatprep.subr.bf16.mxu0 %v1870_v50 }
 0x462   : > { %3482 = vmatpush3.bf16.msra.mxu0 %v1870_v50 }
 0x463   : > { %3483 = vmatprep.subr.bf16.mxu0 %v1869_v55 }
 0x466   : > { %3484 = vmatpush3.bf16.msra.mxu0 %v1869_v55  ;;  %v1922_v55 = vpop.permute.xlu0 %1921 }
 0x469   : > { %3486 = vmatmul.mubr.bf16.vlgmr.msra.gmra.mxu0 %v3688_v34 }
 0x46a   : > { %3489 = vmatprep.mubr.bf16.mxu0 %v3689_v37 }
 0x471   : > { %3490 = vmatmul.mubr.bf16.gmra.mxu0 %v3690_v35 }
 0x472   : > { %3493 = vmatprep.mubr.bf16.mxu0 %v3691_v58 }
 0x479   : > { %3494 = vmatmul.mubr.bf16.gmra.mxu0 %v3692_v56 }
 0x47a   : > { %3497 = vmatprep.mubr.bf16.mxu0 %v3693_v1  ;;  %v1917_v1 = vpop.permute.xlu1 %1916 }
 0x481   : > { %3498 = vmatmul.mubr.bf16.gmra.mxu0 %v3694_v57 }
 0x529   : > { %v4645_v2 = vpop.f32.mrf.mxu0 }
 0x52a   : > { %v2080_v58 = vadd.f32 %v4645_v2, %v1922_v55  ;;  %v3696_v2 = vld [vmem:[%s4856_s6 + $0x8] sm:$0xff]  }
 0x52b   : > { %v4647_v4 = vpop.f32.mrf.mxu0 }
 0x52d   : > { %v3488_v7 = vpop.f32.mrf.mxu0 }
 0x52e   : > { %v2083_v34 = vadd.f32 %v3488_v7, %v1927_v49 }
 0x52f   : > { %v4649_v63 = vpop.f32.mrf.mxu0 }
 0x530   : > { %v2137_v57 = vmax.f32 %v2083_v34, 0.0  ;;  %v2075_v62 = vadd.f32 %v4649_v63, %v1917_v1  ;;  %v3697_v63 = vld [vmem:[%s4856_s6 + $0x10] sm:$0xff]  }
 0x531   : > { %v3491_v6 = vpop.f32.mrf.mxu0 }
 0x532   : > { %v2096_v31 = vadd.f32 %v3491_v6, %v1942_v14  ;;  %v1912_v6 = vpop.permute.xlu0 %1911  ;;  %v2135_v7 = vmax.f32 %v2075_v62, 0.0 }
 0x533   : > { %v2087_v8 = vpop.f32.mrf.mxu0 }
 0x534   : > { %v2140_v36 = vmax.f32 %v2096_v31, 0.0  ;;  %v2088_v50 = vadd.f32 %v2087_v8, %v1932_v30  ;;  %v2072_v8 = vadd.f32 %v4647_v4, %v1912_v6  ;;  %v3698_v4 = vld [vmem:[%s4856_s6 + $0x18] sm:$0xff]  }
 0x535   : > { %v3492_v16 = vpop.f32.mrf.mxu0 }
 0x536   : > { %v2099_v53 = vadd.f32 %v3492_v16, %v1947_v48  ;;  %v2138_v56 = vmax.f32 %v2088_v50, 0.0 }
 0x537   : > { %v2090_v33 = vpop.f32.mrf.mxu0 }
 0x538   : > { %v2141_v41 = vmax.f32 %v2099_v53, 0.0  ;;  %v2091_v45 = vadd.f32 %v2090_v33, %v1937_v47 }
 0x539   : > { %v3495_v39 = vpop.f32.mrf.mxu0 }
 0x53a   : > { %v2112_v59 = vadd.f32 %v3495_v39, %v1962_v0  ;;  %v2153_v37 = vpack.c.bf16 %v2141_v41, %v2140_v36  ;;  %v2139_v35 = vmax.f32 %v2091_v45, 0.0  ;;  %v3700_v39 = vld [vmem:[%s4856_s6 + $0x28] sm:$0xff]  }
 0x53b   : > { %v2103_v32 = vpop.f32.mrf.mxu0 }
 0x53c   : > { %v2144_v25 = vmax.f32 %v2112_v59, 0.0  ;;  %v2104_v44 = vadd.f32 %v2103_v32, %v1952_v15  ;;  %v3701_v32 = vld [vmem:[%s4856_s6 + $0x30] sm:$0xff]   ;;  %v2263_v15 = vpop.permute.xlu0 %2262 }
 0x53d   : > { %v3496_v12 = vpop.f32.mrf.mxu0 }
 0x53e   : > { %v2115_v20 = vadd.f32 %v3496_v12, %v1967_v42  ;;  %v2142_v40 = vmax.f32 %v2104_v44, 0.0  ;;  %v3702_v42 = vld [vmem:[%s4856_s6 + $0x38] sm:$0xff]   ;;  %v3703_v12 = vld [vmem:[%s4857_s7] sm:$0xff]  }
 0x53f   : > { %v2106_v38 = vpop.f32.mrf.mxu0  ;;  %3549 = vmatprep.mubr.bf16.mxu0 %v3703_v12 }
 0x540   : > { %v2145_v28 = vmax.f32 %v2115_v20, 0.0  ;;  %v2107_v24 = vadd.f32 %v2106_v38, %v1957_v13  ;;  %v2253_v20 = vpop.permute.xlu0 %2252 }
 0x541   : > { %v3499_v43 = vpop.f32.mrf.mxu0 }
 0x542   : > { %v2128_v51 = vadd.f32 %v3499_v43, %v1982_v10  ;;  %v2155_v26 = vpack.c.bf16 %v2145_v28, %v2144_v25  ;;  %v2143_v27 = vmax.f32 %v2107_v24, 0.0  ;;  %v2136_v10 = vmax.f32 %v2080_v58, 0.0 }
 0x543   : > { %v2119_v54 = vpop.f32.mrf.mxu0 }
 0x544   : > { %v2120_v52 = vadd.f32 %v2119_v54, %v1972_v9  ;;  %v2148_v19 = vmax.f32 %v2128_v51, 0.0  ;;  %v2154_v46 = vpack.c.bf16 %v2143_v27, %v2142_v40  ;;  %v2151_v16 = vpack.c.bf16 %v2137_v57, %v2136_v10  ;;  %v3699_v9 = vld [vmem:[%s4856_s6 + $0x20] sm:$0xff]   ;;  %v2268_v54 = vpop.permute.xlu1 %2267  ;;  %v2243_v59 = vpop.permute.xlu0 %2242 }
 0x545   : > { %v3500_v18 = vpop.f32.mrf.mxu0 }
 0x546   : > { %v2131_v5 = vadd.f32 %v3500_v18, %v1987_v3  ;;  %v2146_v11 = vmax.f32 %v2120_v52, 0.0  ;;  %v2152_v3 = vpack.c.bf16 %v2139_v35, %v2138_v56 }
 0x547   : > { %v2122_v60 = vpop.f32.mrf.mxu0 }
 0x548   : > { %v2149_v61 = vmax.f32 %v2131_v5, 0.0  ;;  %v2123_v22 = vadd.f32 %v2122_v60, %v1977_v17  ;;  %v2134_v17 = vmax.f32 %v2072_v8, 0.0  ;;  %v2258_v5 = vpop.permute.xlu1 %2257  ;;  %v2233_v24 = vpop.permute.xlu0 %2232 }
 0x54a   : > { %v2157_v21 = vpack.c.bf16 %v2149_v61, %v2148_v19  ;;  %v2147_v23 = vmax.f32 %v2123_v22, 0.0  ;;  %v2150_v33 = vpack.c.bf16 %v2135_v7, %v2134_v17 }
 0x54c   : > { %v2156_v29 = vpack.c.bf16 %v2147_v23, %v2146_v11  ;;  %3501 = vmatprep.subr.bf16.mxu1 %v2157_v21  ;;  %v2248_v22 = vpop.permute.xlu1 %2247  ;;  %v2223_v49 = vpop.permute.xlu0 %2222 }
 0x54d   : > { %3502 = vmatpush3.bf16.msra.mxu1 %v2157_v21 }
 0x54e   : > { %3503 = vmatprep.subr.bf16.mxu1 %v2156_v29 }
 0x550   : > { %v2238_v23 = vpop.permute.xlu1 %2237  ;;  %v2213_v57 = vpop.permute.xlu0 %2212 }
 0x551   : > { %3504 = vmatpush3.bf16.msra.mxu1 %v2156_v29 }
 0x552   : > { %3505 = vmatprep.subr.bf16.mxu1 %v2155_v26 }
 0x554   : > { %v2228_v31 = vpop.permute.xlu1 %2227 }
 0x555   : > { %3506 = vmatpush3.bf16.msra.mxu1 %v2155_v26 }
 0x556   : > { %3507 = vmatprep.subr.bf16.mxu1 %v2154_v46 }
 0x558   : > { %v2218_v35 = vpop.permute.xlu1 %2217 }
 0x559   : > { %3508 = vmatpush3.bf16.msra.mxu1 %v2154_v46 }
 0x55a   : > { %3509 = vmatprep.subr.bf16.mxu1 %v2153_v37 }
 0x55d   : > { %3510 = vmatpush3.bf16.msra.mxu1 %v2153_v37 }
 0x55e   : > { %3511 = vmatprep.subr.bf16.mxu1 %v2152_v3 }
 0x561   : > { %3512 = vmatpush3.bf16.msra.mxu1 %v2152_v3 }
 0x562   : > { %3513 = vmatprep.subr.bf16.mxu1 %v2151_v16 }
 0x565   : > { %3514 = vmatpush3.bf16.msra.mxu1 %v2151_v16  ;;  %v2208_v16 = vpop.permute.xlu1 %2207 }
 0x566   : > { %3515 = vmatprep.subr.bf16.mxu1 %v2150_v33 }
 0x569   : > { %3516 = vmatpush3.bf16.msra.mxu1 %v2150_v33  ;;  %v2203_v33 = vpop.permute.xlu0 %2202 }
 0x56c   : > { %3518 = vmatmul.mubr.bf16.vlgmr.msra.gmra.mxu1 %v3696_v2 }
 0x56d   : > { %3521 = vmatprep.mubr.bf16.mxu1 %v3697_v63 }
 0x574   : > { %3522 = vmatmul.mubr.bf16.gmra.mxu1 %v3698_v4 }
 0x575   : > { %3525 = vmatprep.mubr.bf16.mxu1 %v3699_v9 }
 0x57c   : > { %3526 = vmatmul.mubr.bf16.gmra.mxu1 %v3700_v39 }
 0x57d   : > { %3529 = vmatprep.mubr.bf16.mxu1 %v3701_v32  ;;  %v2198_v32 = vpop.permute.xlu1 %2197 }
 0x584   : > { %3530 = vmatmul.mubr.bf16.gmra.mxu1 %v3702_v42 }
 0x62c   : > { %v4678_v0 = vpop.f32.mrf.mxu1 }
 0x62d   : > { %v2361_v9 = vadd.f32 %v4678_v0, %v2203_v33  ;;  %v3704_v0 = vld [vmem:[%s4857_s7 + $0x8] sm:$0xff]  }
 0x62e   : > { %v4680_v38 = vpop.f32.mrf.mxu1 }
 0x630   : > { %v3520_v43 = vpop.f32.mrf.mxu1 }
 0x631   : > { %v2364_v2 = vadd.f32 %v3520_v43, %v2208_v16 }
 0x632   : > { %v4682_v13 = vpop.f32.mrf.mxu1 }
 0x633   : > { %v2418_v42 = vmax.f32 %v2364_v2, 0.0  ;;  %v2356_v12 = vadd.f32 %v4682_v13, %v2198_v32  ;;  %v3705_v13 = vld [vmem:[%s4857_s7 + $0x10] sm:$0xff]  }
 0x634   : > { %v3523_v51 = vpop.f32.mrf.mxu1 }
 0x635   : > { %v2377_v62 = vadd.f32 %v3523_v51, %v2223_v49  ;;  %v2193_v51 = vpop.permute.xlu0 %2192  ;;  %v2416_v43 = vmax.f32 %v2356_v12, 0.0 }
 0x636   : > { %v2368_v18 = vpop.f32.mrf.mxu1 }
 0x637   : > { %v2421_v7 = vmax.f32 %v2377_v62, 0.0  ;;  %v2369_v17 = vadd.f32 %v2368_v18, %v2213_v57  ;;  %v2353_v18 = vadd.f32 %v4680_v38, %v2193_v51  ;;  %v3706_v38 = vld [vmem:[%s4857_s7 + $0x18] sm:$0xff]  }
 0x638   : > { %v3524_v52 = vpop.f32.mrf.mxu1 }
 0x639   : > { %v2380_v58 = vadd.f32 %v3524_v52, %v2228_v31  ;;  %v2419_v39 = vmax.f32 %v2369_v17, 0.0 }
 0x63a   : > { %v2371_v60 = vpop.f32.mrf.mxu1 }
 0x63b   : > { %v2422_v6 = vmax.f32 %v2380_v58, 0.0  ;;  %v2372_v10 = vadd.f32 %v2371_v60, %v2218_v35 }
 0x63c   : > { %v3527_v19 = vpop.f32.mrf.mxu1 }
 0x63d   : > { %v2393_v40 = vadd.f32 %v3527_v19, %v2243_v59  ;;  %v2434_v63 = vpack.c.bf16 %v2422_v6, %v2421_v7  ;;  %v2420_v4 = vmax.f32 %v2372_v10, 0.0  ;;  %v3708_v19 = vld [vmem:[%s4857_s7 + $0x28] sm:$0xff]  }
 0x63e   : > { %v2384_v61 = vpop.f32.mrf.mxu1 }
 0x63f   : > { %v2425_v34 = vmax.f32 %v2393_v40, 0.0  ;;  %v2385_v37 = vadd.f32 %v2384_v61, %v2233_v24  ;;  %v3709_v61 = vld [vmem:[%s4857_s7 + $0x30] sm:$0xff]   ;;  %v2544_v24 = vpop.permute.xlu0 %2543 }
 0x640   : > { %v3528_v48 = vpop.f32.mrf.mxu1 }
 0x641   : > { %v2396_v53 = vadd.f32 %v3528_v48, %v2248_v22  ;;  %v2423_v3 = vmax.f32 %v2385_v37, 0.0  ;;  %v3710_v22 = vld [vmem:[%s4857_s7 + $0x38] sm:$0xff]   ;;  %v3711_v48 = vld [vmem:[%s4858_s8] sm:$0xff]  }
 0x642   : > { %v2387_v11 = vpop.f32.mrf.mxu1  ;;  %3581 = vmatprep.mubr.bf16.mxu1 %v3711_v48 }
 0x643   : > { %v2426_v36 = vmax.f32 %v2396_v53, 0.0  ;;  %v2388_v50 = vadd.f32 %v2387_v11, %v2238_v23  ;;  %v2534_v53 = vpop.permute.xlu0 %2533 }
 0x644   : > { %v3531_v21 = vpop.f32.mrf.mxu1 }
 0x645   : > { %v2409_v28 = vadd.f32 %v3531_v21, %v2263_v15  ;;  %v2436_v56 = vpack.c.bf16 %v2426_v36, %v2425_v34  ;;  %v2424_v1 = vmax.f32 %v2388_v50, 0.0  ;;  %v2417_v15 = vmax.f32 %v2361_v9, 0.0 }
 0x646   : > { %v2400_v14 = vpop.f32.mrf.mxu1 }
 0x647   : > { %v2401_v25 = vadd.f32 %v2400_v14, %v2253_v20  ;;  %v2429_v26 = vmax.f32 %v2409_v28, 0.0  ;;  %v2435_v8 = vpack.c.bf16 %v2424_v1, %v2423_v3  ;;  %v2432_v52 = vpack.c.bf16 %v2418_v42, %v2417_v15  ;;  %v3707_v20 = vld [vmem:[%s4857_s7 + $0x20] sm:$0xff]   ;;  %v2549_v14 = vpop.permute.xlu1 %2548  ;;  %v2524_v40 = vpop.permute.xlu0 %2523 }
 0x648   : > { %v3532_v29 = vpop.f32.mrf.mxu1 }
 0x649   : > { %v2412_v44 = vadd.f32 %v3532_v29, %v2268_v54  ;;  %v2427_v41 = vmax.f32 %v2401_v25, 0.0  ;;  %v2433_v54 = vpack.c.bf16 %v2420_v4, %v2419_v39 }
 0x64a   : > { %v2403_v47 = vpop.f32.mrf.mxu1 }
 0x64b   : > { %v2430_v27 = vmax.f32 %v2412_v44, 0.0  ;;  %v2404_v30 = vadd.f32 %v2403_v47, %v2258_v5  ;;  %v2415_v5 = vmax.f32 %v2353_v18, 0.0  ;;  %v2539_v44 = vpop.permute.xlu1 %2538  ;;  %v2514_v50 = vpop.permute.xlu0 %2513 }
 0x64d   : > { %v2438_v45 = vpack.c.bf16 %v2430_v27, %v2429_v26  ;;  %v2428_v46 = vmax.f32 %v2404_v30, 0.0  ;;  %v2431_v60 = vpack.c.bf16 %v2416_v43, %v2415_v5 }
 0x64f   : > { %v2437_v55 = vpack.c.bf16 %v2428_v46, %v2427_v41  ;;  %3533 = vmatprep.subr.bf16.mxu0 %v2438_v45  ;;  %v2529_v30 = vpop.permute.xlu1 %2528  ;;  %v2504_v16 = vpop.permute.xlu0 %2503 }
 0x650   : > { %3534 = vmatpush3.bf16.msra.mxu0 %v2438_v45 }
 0x651   : > { %3535 = vmatprep.subr.bf16.mxu0 %v2437_v55 }
 0x653   : > { %v2519_v46 = vpop.permute.xlu1 %2518  ;;  %v2494_v42 = vpop.permute.xlu0 %2493 }
 0x654   : > { %3536 = vmatpush3.bf16.msra.mxu0 %v2437_v55 }
 0x655   : > { %3537 = vmatprep.subr.bf16.mxu0 %v2436_v56 }
 0x657   : > { %v2509_v62 = vpop.permute.xlu1 %2508 }
 0x658   : > { %3538 = vmatpush3.bf16.msra.mxu0 %v2436_v56 }
 0x659   : > { %3539 = vmatprep.subr.bf16.mxu0 %v2435_v8 }
 0x65b   : > { %v2499_v4 = vpop.permute.xlu1 %2498 }
 0x65c   : > { %3540 = vmatpush3.bf16.msra.mxu0 %v2435_v8 }
 0x65d   : > { %3541 = vmatprep.subr.bf16.mxu0 %v2434_v63 }
 0x660   : > { %3542 = vmatpush3.bf16.msra.mxu0 %v2434_v63 }
 0x661   : > { %3543 = vmatprep.subr.bf16.mxu0 %v2433_v54 }
 0x664   : > { %3544 = vmatpush3.bf16.msra.mxu0 %v2433_v54 }
 0x665   : > { %3545 = vmatprep.subr.bf16.mxu0 %v2432_v52 }
 0x668   : > { %3546 = vmatpush3.bf16.msra.mxu0 %v2432_v52  ;;  %v2489_v52 = vpop.permute.xlu1 %2488 }
 0x669   : > { %3547 = vmatprep.subr.bf16.mxu0 %v2431_v60 }
 0x66c   : > { %3548 = vmatpush3.bf16.msra.mxu0 %v2431_v60  ;;  %v2484_v60 = vpop.permute.xlu0 %2483 }
 0x66f   : > { %3550 = vmatmul.mubr.bf16.vlgmr.msra.gmra.mxu0 %v3704_v0 }
 0x670   : > { %3553 = vmatprep.mubr.bf16.mxu0 %v3705_v13 }
 0x677   : > { %3554 = vmatmul.mubr.bf16.gmra.mxu0 %v3706_v38 }
 0x678   : > { %3557 = vmatprep.mubr.bf16.mxu0 %v3707_v20 }
 0x67f   : > { %3558 = vmatmul.mubr.bf16.gmra.mxu0 %v3708_v19 }
 0x680   : > { %3561 = vmatprep.mubr.bf16.mxu0 %v3709_v61  ;;  %v2479_v61 = vpop.permute.xlu1 %2478 }
 0x687   : > { %3562 = vmatmul.mubr.bf16.gmra.mxu0 %v3710_v22 }
 0x72f   : > { %v4711_v59 = vpop.f32.mrf.mxu0 }
 0x730   : > { %v2642_v20 = vadd.f32 %v4711_v59, %v2484_v60  ;;  %v3712_v59 = vld [vmem:[%s4858_s8 + $0x8] sm:$0xff]  }
 0x731   : > { %v4713_v11 = vpop.f32.mrf.mxu0 }
 0x733   : > { %v3552_v21 = vpop.f32.mrf.mxu0 }
 0x734   : > { %v2645_v0 = vadd.f32 %v3552_v21, %v2489_v52 }
 0x735   : > { %v4715_v23 = vpop.f32.mrf.mxu0 }
 0x736   : > { %v2699_v22 = vmax.f32 %v2645_v0, 0.0  ;;  %v2637_v48 = vadd.f32 %v4715_v23, %v2479_v61  ;;  %v3714_v23 = vld [vmem:[%s4858_s8 + $0x18] sm:$0xff]  }
 0x737   : > { %v3555_v28 = vpop.f32.mrf.mxu0 }
 0x738   : > { %v2658_v12 = vadd.f32 %v3555_v28, %v2504_v16  ;;  %v2474_v28 = vpop.permute.xlu0 %2473  ;;  %v2697_v21 = vmax.f32 %v2637_v48, 0.0 }
 0x739   : > { %v2649_v29 = vpop.f32.mrf.mxu0 }
 0x73a   : > { %v2702_v43 = vmax.f32 %v2658_v12, 0.0  ;;  %v2650_v5 = vadd.f32 %v2649_v29, %v2494_v42  ;;  %v2634_v29 = vadd.f32 %v4713_v11, %v2474_v28  ;;  %v3713_v11 = vld [vmem:[%s4858_s8 + $0x10] sm:$0xff]  }
 0x73b   : > { %v3556_v25 = vpop.f32.mrf.mxu0 }
 0x73c   : > { %v2661_v9 = vadd.f32 %v3556_v25, %v2509_v62  ;;  %v2700_v19 = vmax.f32 %v2650_v5, 0.0 }
 0x73d   : > { %v2652_v47 = vpop.f32.mrf.mxu0 }
 0x73e   : > { %v2703_v51 = vmax.f32 %v2661_v9, 0.0  ;;  %v2653_v15 = vadd.f32 %v2652_v47, %v2499_v4 }
 0x73f   : > { %v3559_v26 = vpop.f32.mrf.mxu0 }
 0x740   : > { %v2674_v3 = vadd.f32 %v3559_v26, %v2524_v40  ;;  %v2715_v13 = vpack.c.bf16 %v2703_v51, %v2702_v43  ;;  %v2701_v38 = vmax.f32 %v2653_v15, 0.0  ;;  %v3716_v26 = vld [vmem:[%s4858_s8 + $0x28] sm:$0xff]  }
 0x741   : > { %v2665_v27 = vpop.f32.mrf.mxu0 }
 0x742   : > { %v2706_v2 = vmax.f32 %v2674_v3, 0.0  ;;  %v2666_v63 = vadd.f32 %v2665_v27, %v2514_v50  ;;  %v3717_v27 = vld [vmem:[%s4858_s8 + $0x30] sm:$0xff]  }
 0x743   : > { %v3560_v31 = vpop.f32.mrf.mxu0 }
 0x744   : > { %v2677_v58 = vadd.f32 %v3560_v31, %v2529_v30  ;;  %v2704_v54 = vmax.f32 %v2666_v63, 0.0  ;;  %v3718_v30 = vld [vmem:[%s4858_s8 + $0x38] sm:$0xff]  }
 0x745   : > { %v2668_v41 = vpop.f32.mrf.mxu0 }
 0x746   : > { %v2707_v7 = vmax.f32 %v2677_v58, 0.0  ;;  %v2669_v17 = vadd.f32 %v2668_v41, %v2519_v46 }
 0x747   : > { %v3563_v45 = vpop.f32.mrf.mxu0 }
 0x748   : > { %v2690_v36 = vadd.f32 %v3563_v45, %v2544_v24  ;;  %v2717_v39 = vpack.c.bf16 %v2707_v7, %v2706_v2  ;;  %v2705_v32 = vmax.f32 %v2669_v17, 0.0  ;;  %v2698_v24 = vmax.f32 %v2642_v20, 0.0 }
 0x749   : > { %v2681_v49 = vpop.f32.mrf.mxu0 }
 0x74a   : > { %v2682_v34 = vadd.f32 %v2681_v49, %v2534_v53  ;;  %v2710_v56 = vmax.f32 %v2690_v36, 0.0  ;;  %v2716_v18 = vpack.c.bf16 %v2705_v32, %v2704_v54  ;;  %v2713_v25 = vpack.c.bf16 %v2699_v22, %v2698_v24  ;;  %v3715_v53 = vld [vmem:[%s4858_s8 + $0x20] sm:$0xff]  }
 0x74b   : > { %v3564_v55 = vpop.f32.mrf.mxu0 }
 0x74c   : > { %v2693_v37 = vadd.f32 %v3564_v55, %v2549_v14  ;;  %v2708_v6 = vmax.f32 %v2682_v34, 0.0  ;;  %v2714_v14 = vpack.c.bf16 %v2701_v38, %v2700_v19 }
 0x74d   : > { %v2684_v35 = vpop.f32.mrf.mxu0 }
 0x74e   : > { %v2711_v1 = vmax.f32 %v2693_v37, 0.0  ;;  %v2685_v57 = vadd.f32 %v2684_v35, %v2539_v44  ;;  %v2696_v44 = vmax.f32 %v2634_v29, 0.0 }
 0x750   : > { %v2719_v10 = vpack.c.bf16 %v2711_v1, %v2710_v56  ;;  %v2709_v8 = vmax.f32 %v2685_v57, 0.0  ;;  %v2712_v47 = vpack.c.bf16 %v2697_v21, %v2696_v44 }
 0x752   : > { %v2718_v33 = vpack.c.bf16 %v2709_v8, %v2708_v6  ;;  %3565 = vmatprep.subr.bf16.mxu1 %v2719_v10 }
 0x753   : > { %3566 = vmatpush3.bf16.msra.mxu1 %v2719_v10 }
 0x754   : > { %3567 = vmatprep.subr.bf16.mxu1 %v2718_v33 }
 0x757   : > { %3568 = vmatpush3.bf16.msra.mxu1 %v2718_v33 }
 0x758   : > { %3569 = vmatprep.subr.bf16.mxu1 %v2717_v39 }
 0x75b   : > { %3570 = vmatpush3.bf16.msra.mxu1 %v2717_v39 }
 0x75c   : > { %3571 = vmatprep.subr.bf16.mxu1 %v2716_v18 }
 0x75f   : > { %3572 = vmatpush3.bf16.msra.mxu1 %v2716_v18 }
 0x760   : > { %3573 = vmatprep.subr.bf16.mxu1 %v2715_v13 }
 0x763   : > { %3574 = vmatpush3.bf16.msra.mxu1 %v2715_v13 }
 0x764   : > { %3575 = vmatprep.subr.bf16.mxu1 %v2714_v14 }
 0x767   : > { %3576 = vmatpush3.bf16.msra.mxu1 %v2714_v14 }
 0x768   : > { %3577 = vmatprep.subr.bf16.mxu1 %v2713_v25 }
 0x76b   : > { %3578 = vmatpush3.bf16.msra.mxu1 %v2713_v25 }
 0x76c   : > { %3579 = vmatprep.subr.bf16.mxu1 %v2712_v47 }
 0x76f   : > { %3580 = vmatpush3.bf16.msra.mxu1 %v2712_v47 }
 0x772   : > { %3582 = vmatmul.mubr.bf16.vlgmr.msra.gmra.mxu1 %v3712_v59 }
 0x773   : > { %3585 = vmatprep.mubr.bf16.mxu1 %v3713_v11 }
 0x77a   : > { %3586 = vmatmul.mubr.bf16.gmra.mxu1 %v3714_v23 }
 0x77b   : > { %3589 = vmatprep.mubr.bf16.mxu1 %v3715_v53 }
 0x782   : > { %3590 = vmatmul.mubr.bf16.gmra.mxu1 %v3716_v26 }
 0x783   : > { %3593 = vmatprep.mubr.bf16.mxu1 %v3717_v27 }
 0x78a   : > { %3594 = vmatmul.mubr.bf16.gmra.mxu1 %v3718_v30 }
 0x78b   : > { %3732 = shalt.err (!%p3729_p5)
}
 0x78c   : > { %s3733_s4 = scalar_lea.hbm %s4750_s3, 2048  ;;  %s3737_s24 = scalar_lea.hbm %s4867_s17, 8192 }
 0x78d   : > { %p3734_p7 = scmp.ne.s32.totalorder %s4750_s3, %s3733_s4  ;;  %p3738_p11 = scmp.lt.s32.totalorder %s4750_s3, %s4867_s17 }
 0x78e   : > { %p3739_p12 = scmp.lt.s32.totalorder %s3737_s24, %s3733_s4 }
 0x78f   : > { %p3735_p9 = pnand %p3734_p7, %p3950_p6 }
 0x790   : > { %p3740_p13 = por %p3739_p12, %p3738_p11 }
 0x791   : > { %p3736_p10 = pneg %p3735_p9 }
 0x793   : > { %p3741_p0 = pnand %p3740_p13, %p3736_p10 }
 0x795   : > { %3744 = shalt.err (!%p3741_p0)
}
 0x796   : > { %s4877_s9 = smov 128   ;;  %s4878_s1 = smov 512   ;;  %v2755_v31 = vpop.permute.xlu0 %2754  ;;  %v2760_v40 = vpop.permute.xlu1 %2759 }
 0x797   : > { %s3815_s26 = smov 8   ;;  %s4900_s19 = scalar_lea.sflag [#allocation4], %s3991_s22 }
 0x798   : > { %3597 = dma.vmem_to_hbm [thread:$0]  (%p3950_p6), %s4752_s28, 2048, %s4750_s3, %s4900_s19, %s4877_s9, %s4878_s1, %s3815_s26  }
 0x799   : > { %s4901_s25 = sshll.u32 %s3991_s22, 7  ;;  %s4804_s24 = scalar_lea.hbm %s4868_s18, %s4743_s0 }
 0x79a   : > { %v2765_v41 = vpop.permute.xlu0 %2764  ;;  %v2770_v45 = vpop.permute.xlu1 %2769  ;;  %s4782_s4 = scalar_lea.vmem [#allocation5], %s4901_s25  ;;  %s2999_s29 = scalar_lea.sflag [#allocation6], %s3991_s22 }
 0x79b   : > { %s3026_s28 = sshll.u32 %s4782_s4, 4  ;;  %s3816_s25 = smov [#allocation5]   ;;  %s4806_s28 = int_to_ptr.vmem [resolvable:$true] %s3026_s28 }
 0x79c   : > { %s3745_s19 = scalar_lea.vmem %s4806_s28, 2048  ;;  %s3749_s9 = sshll.u32 %s3816_s25, 4  ;;  %s3750_s9 = int_to_ptr.vmem [resolvable:$false] %s3749_s9 }
 0x79d   : > { %p3746_p1 = scmp.ne.s32.totalorder %s4806_s28, %s3745_s19  ;;  %s3751_s1 = scalar_lea.vmem %s3750_s9, 4096 }
 0x79e   : > { %v2775_v46 = vpop.permute.xlu0 %2774  ;;  %v2780_v49 = vpop.permute.xlu1 %2779  ;;  %p3752_p4 = scmp.lt.s32.totalorder %s4806_s28, %s3750_s9  ;;  %p3753_p5 = scmp.lt.s32.totalorder %s3751_s1, %s3745_s19 }
 0x79f   : > { %p3747_p2 = pnand %p3746_p1, %p3950_p6 }
 0x7a0   : > { %p3754_p7 = por %p3753_p5, %p3752_p4 }
 0x7a1   : > { %p3748_p3 = pneg %p3747_p2 }
 0x7a2   : > { %v2785_v36 = vpop.permute.xlu0 %2784  ;;  %v2790_v35 = vpop.permute.xlu1 %2789 }
 0x7a3   : > { %p3755_p9 = pnand %p3754_p7, %p3748_p3 }
 0x7a6   : > { %v2795_v1 = vpop.permute.xlu0 %2794  ;;  %v2800_v10 = vpop.permute.xlu1 %2799 }
 0x7aa   : > { %v2805_v7 = vpop.permute.xlu0 %2804  ;;  %v2810_v4 = vpop.permute.xlu1 %2809 }
 0x7ae   : > { %v2815_v32 = vpop.permute.xlu0 %2814  ;;  %v2820_v15 = vpop.permute.xlu1 %2819 }
 0x7b2   : > { %v2825_v43 = vpop.permute.xlu0 %2824  ;;  %v2830_v38 = vpop.permute.xlu1 %2829 }
 0x832   : > { %v3583_v50 = vpop.f32.mrf.mxu1 }
 0x833   : > { %v2923_v55 = vadd.f32 %v3583_v50, %v2765_v41 }
 0x834   : > { %v2914_v34 = vpop.f32.mrf.mxu1 }
 0x835   : > { %2979 = vst [vmem:[%s4782_s4 + $0x10] sm:$0xff] %v2923_v55  ;;  %v2915_v37 = vadd.f32 %v2914_v34, %v2755_v31 }
 0x836   : > { %v3584_v58 = vpop.f32.mrf.mxu1 }
 0x837   : > { %2977 = vst [vmem:[%s4782_s4] sm:$0xff] %v2915_v37  ;;  %v2926_v56 = vadd.f32 %v3584_v58, %v2770_v45 }
 0x838   : > { %v2917_v57 = vpop.f32.mrf.mxu1 }
 0x839   : > { %2980 = vst [vmem:[%s4782_s4 + $0x18] sm:$0xff] %v2926_v56  ;;  %v2918_v62 = vadd.f32 %v2917_v57, %v2760_v40 }
 0x83a   : > { %v3587_v3 = vpop.f32.mrf.mxu1 }
 0x83b   : > { %2978 = vst [vmem:[%s4782_s4 + $0x8] sm:$0xff] %v2918_v62  ;;  %v2939_v6 = vadd.f32 %v3587_v3, %v2785_v36 }
 0x83c   : > { %v2930_v8 = vpop.f32.mrf.mxu1 }
 0x83d   : > { %2983 = vst [vmem:[%s4782_s4 + $0x30] sm:$0xff] %v2939_v6  ;;  %v2931_v16 = vadd.f32 %v2930_v8, %v2775_v46 }
 0x83e   : > { %v3588_v17 = vpop.f32.mrf.mxu1 }
 0x83f   : > { %2981 = vst [vmem:[%s4782_s4 + $0x20] sm:$0xff] %v2931_v16  ;;  %v2942_v33 = vadd.f32 %v3588_v17, %v2790_v35 }
 0x840   : > { %v2933_v2 = vpop.f32.mrf.mxu1 }
 0x841   : > { %2984 = vst [vmem:[%s4782_s4 + $0x38] sm:$0xff] %v2942_v33  ;;  %v2934_v63 = vadd.f32 %v2933_v2, %v2780_v49 }
 0x842   : > { %v3591_v9 = vpop.f32.mrf.mxu1 }
 0x843   : > { %2982 = vst [vmem:[%s4782_s4 + $0x28] sm:$0xff] %v2934_v63  ;;  %v2955_v39 = vadd.f32 %v3591_v9, %v2805_v7 }
 0x844   : > { %v2946_v42 = vpop.f32.mrf.mxu1 }
 0x845   : > { %2987 = vst [vmem:[%s4782_s4 + $0x50] sm:$0xff] %v2955_v39  ;;  %v2947_v12 = vadd.f32 %v2946_v42, %v2795_v1 }
 0x846   : > { %v3592_v54 = vpop.f32.mrf.mxu1 }
 0x847   : > { %2985 = vst [vmem:[%s4782_s4 + $0x40] sm:$0xff] %v2947_v12  ;;  %v2958_v51 = vadd.f32 %v3592_v54, %v2810_v4 }
 0x848   : > { %v2949_v18 = vpop.f32.mrf.mxu1 }
 0x849   : > { %2988 = vst [vmem:[%s4782_s4 + $0x58] sm:$0xff] %v2958_v51  ;;  %v2950_v52 = vadd.f32 %v2949_v18, %v2800_v10 }
 0x84a   : > { %v3595_v5 = vpop.f32.mrf.mxu1 }
 0x84b   : > { %2986 = vst [vmem:[%s4782_s4 + $0x48] sm:$0xff] %v2950_v52  ;;  %v2971_v60 = vadd.f32 %v3595_v5, %v2825_v43 }
 0x84c   : > { %v2962_v0 = vpop.f32.mrf.mxu1 }
 0x84d   : > { %2991 = vst [vmem:[%s4782_s4 + $0x70] sm:$0xff] %v2971_v60  ;;  %v2963_v13 = vadd.f32 %v2962_v0, %v2815_v32 }
 0x84e   : > { %v3596_v20 = vpop.f32.mrf.mxu1 }
 0x84f   : > { %2989 = vst [vmem:[%s4782_s4 + $0x60] sm:$0xff] %v2963_v13  ;;  %v2974_v19 = vadd.f32 %v3596_v20, %v2830_v38 }
 0x850   : > { %v2965_v61 = vpop.f32.mrf.mxu1 }
 0x851   : > { %2992 = vst [vmem:[%s4782_s4 + $0x78] sm:$0xff] %v2974_v19  ;;  %v2966_v22 = vadd.f32 %v2965_v61, %v2820_v15 }
 0x853   : > { %2990 = vst [vmem:[%s4782_s4 + $0x68] sm:$0xff] %v2966_v22 }
 0x854   : > { %3758 = shalt.err (!%p3755_p9)
}
 0x855   : > { %s3759_s0 = scalar_lea.hbm %s4804_s24, 2048  ;;  %s3763_s3 = scalar_lea.hbm %s4868_s18, 8192 }
 0x856   : > { %p3760_p10 = scmp.ne.s32.totalorder %s4804_s24, %s3759_s0  ;;  %p3764_p13 = scmp.lt.s32.totalorder %s4804_s24, %s4868_s18 }
 0x857   : > { %p3765_p0 = scmp.lt.s32.totalorder %s3763_s3, %s3759_s0 }
 0x858   : > { %p3761_p11 = pnand %p3760_p10, %p3950_p6 }
 0x859   : > { %p3766_p1 = por %p3765_p0, %p3764_p13 }
 0x85a   : > { %p3762_p12 = pneg %p3761_p11 }
 0x85c   : > { %p3767_p2 = pnand %p3766_p1, %p3762_p12 }
 0x85e   : > { %3770 = shalt.err (!%p3767_p2)
}
 0x85f   : > { %s4902_s9 = smov 512   ;;  %s4903_s1 = smov 128  }
 0x860   : > { %3598 = dma.vmem_to_hbm [thread:$0]  (%p3950_p6), %s4806_s28, 2048, %s4804_s24, %s2999_s29, %s4903_s1, %s4902_s9, %s3815_s26  }
 0x861 PF: > { %p3608_p3 = scmp.ge.s32.totalorder %s3809_s30, 2  ;;  %s3041_s19 = sand.u32 1, %s3797_s27  }
 0x862   : > { %s3042_s0 = scalar_lea.sflag [#allocation4], %s3041_s19 }
 0x863   : > { %p3602_p4 = pnand %p3608_p3, %p3954_p8 }
 0x865   : > { %p3603_p5 = pneg %p3602_p4 }
 0x867   : > { %3788 = dma.done.wait (%p3603_p5), %s3042_s0, 2048  }
 0x868   : > { %3790 = vsyncadd (%p3603_p5), %s3042_s0, 4294965248  ;;  %s3051_s22 = scalar_lea.sflag [#allocation6], %s3041_s19 }
 0x869   : > { %3792 = dma.done.wait (%p3603_p5), %s3051_s22, 2048  }
 0x86a   : > { %3794 = vsyncadd (%p3603_p5), %s3051_s22, 4294965248  ;;  %s4904_s30 = sld [smem:[#allocation11_spill]] }
 0x86b   : > { %s4905_s27 = sld [smem:[#allocation9_spill]] }
 0x86c   : > { %s4906_s28 = sld [smem:[#allocation10_spill]] }
 0x86d   : > { %s4907_s29 = sld [smem:[#allocation12_spill]] }
 0x870   : > { %p32_p6 = scmp.ge.s32.totalorder %s4904_s30, 6  }
 0x872   :  { %34 = sbr.rel (!%p32_p6) target bundleno = 13 (0xd), region = 186 }
 0x877   :  { %3056 = vsyncpa [#allocation4], 1 }
 0x878   :  { %3058 = vsyncpa [#allocation4 + $0x1], 1 }
 0x879   :  { %3059 = vsyncpa [#allocation6], 1 }
 0x87a   :  { %3061 = vsyncpa [#allocation6 + $0x1], 1 }

</bundles_post_ra>
